<compile_context>
chip_gen: v5e
topology: v5e:2x2
jax: 0.10.0
libtpu: 0.0.40
codegen_flags: <defaults>
</compile_context>

<pallas_src>
import functools

import jax
import jax.numpy as jnp
from jax.experimental import pallas as pl
from jax.experimental.pallas import tpu as pltpu

# True layer widths from MLP_extend.__init__:
#   Linear(1,50) -> Linear(50,100) -> Linear(100,100) x3 -> Linear(100,50) -> Linear(50,1)
DIMS = [1, 50, 100, 100, 100, 100, 50, 1]
N_LAYERS = len(DIMS) - 1  # 7
PAD = 128                 # lane-aligned feature width used inside the kernel
TB = 256                  # batch tile (rows per grid step)


def mlp_kernel(x_ref, *refs):
    """refs = (w1, b1, w2, b2, ..., w7, b7, o_ref).

    x_ref : [TB, 1]   f32
    w1    : [1, PAD]  f32   (used on the VPU, K=1 layer)
    b*    : [1, PAD]  f32
    w2..7 : [PAD,PAD] bf16  (MXU operands, f32 accumulation)
    o_ref : [TB, PAD] f32   (lane-dense store; real output is column 0)
    """
    o_ref = refs[-1]
    params = refs[:-1]

    x = x_ref[...]                       # [TB, 1] f32
    w1 = params[0][...]                  # [1, PAD] f32
    b1 = params[1][...]                  # [1, PAD] f32

    # Layer 1 (in_features == 1): outer product on the VPU, skip the MXU.
    h = jnp.maximum(x * w1 + b1, 0.0)    # [TB, PAD] f32

    for i in range(1, N_LAYERS):
        w = params[2 * i][...]           # [PAD, PAD] bf16
        b = params[2 * i + 1][...]       # [1, PAD]  f32
        acc = jnp.dot(h.astype(jnp.bfloat16), w,
                      preferred_element_type=jnp.float32) + b
        if i < N_LAYERS - 1:
            h = jnp.maximum(acc, 0.0)    # ReLU
        else:
            h = jax.nn.sigmoid(acc)      # final Sigmoid (padded lanes -> 0.5, sliced off)

    o_ref[...] = h.astype(o_ref.dtype)


def prepare_params(params_flat):
    """Zero-pad true-shape params to lane-aligned PAD widths and cast MXU weights to bf16."""
    padded = []
    for i in range(N_LAYERS):
        w, b = params_flat[2 * i], params_flat[2 * i + 1]
        fan_in, fan_out = w.shape
        if i == 0:
            # kept f32, used on the VPU: [1, PAD]
            w_p = jnp.zeros((1, PAD), jnp.float32).at[:, :fan_out].set(w)
        else:
            w_p = jnp.zeros((PAD, PAD), jnp.float32).at[:fan_in, :fan_out].set(w)
            w_p = w_p.astype(jnp.bfloat16)
        b_p = jnp.zeros((1, PAD), jnp.float32).at[:, :fan_out].set(b)
        padded += [w_p, b_p]
    return padded


@functools.partial(jax.jit, static_argnames=("tb",))
def mlp_extend_forward(x, padded_params, *, tb=TB):
    """x: [B, 1] float32.  padded_params: output of prepare_params."""
    B = x.shape[0]
    n_blocks = pl.cdiv(B, tb)
    B_pad = n_blocks * tb
    if B_pad != B:
        x = jnp.pad(x, ((0, B_pad - B), (0, 0)))

    in_specs = [pl.BlockSpec((tb, 1), lambda i: (i, 0))]          # activations: tiled
    for p in padded_params:                                       # params: VMEM-resident
        in_specs.append(pl.BlockSpec(p.shape, lambda i: (0, 0)))
    out_spec = pl.BlockSpec((tb, PAD), lambda i: (i, 0))          # lane-dense output

    out = pl.pallas_call(
        mlp_kernel,
        out_shape=jax.ShapeDtypeStruct((B_pad, PAD), jnp.float32),
        grid=(n_blocks,),
        in_specs=in_specs,
        out_specs=out_spec,
        compiler_params=pltpu.CompilerParams(
            dimension_semantics=("parallel",)   # megacore sharding on v7x
        ),
    )(x, *padded_params)

    return out[:B, :1]


def init_params(key):
    """Deterministic synthetic init (PyTorch-Linear-like uniform fan-in scaling), true shapes."""
    params = []
    for i in range(N_LAYERS):
        fan_in, fan_out = DIMS[i], DIMS[i + 1]
        key, kw, kb = jax.random.split(key, 3)
        bound = 1.0 / jnp.sqrt(jnp.float32(fan_in))
        w = jax.random.uniform(kw, (fan_in, fan_out), jnp.float32, -bound, bound)
        b = jax.random.uniform(kb, (1, fan_out), jnp.float32, -bound, bound)
        params += [w, b]
    return params


def reference_forward_f32(x, params_flat):
    """Pure-f32 plain-JAX reference of the PyTorch forward pass."""
    h = x
    for i in range(N_LAYERS):
        w, b = params_flat[2 * i], params_flat[2 * i + 1]
        h = h @ w + b
        h = jnp.maximum(h, 0.0) if i < N_LAYERS - 1 else jax.nn.sigmoid(h)
    return h


def reference_forward_like_kernel(x, padded_params):
    """Plain-JAX reference that mirrors the kernel's padding / bf16 strategy exactly."""
    w1, b1 = padded_params[0], padded_params[1]
    h = jnp.maximum(x * w1 + b1, 0.0)
    for i in range(1, N_LAYERS):
        w, b = padded_params[2 * i], padded_params[2 * i + 1]
        acc = jnp.dot(h.astype(jnp.bfloat16), w,
                      preferred_element_type=jnp.float32) + b
        h = jnp.maximum(acc, 0.0) if i < N_LAYERS - 1 else jax.nn.sigmoid(acc)
    return h[:, :1]


if __name__ == "__main__":
    key = jax.random.PRNGKey(0)
    key, kx = jax.random.split(key)

    B = 512  # batch; input feature dim is 1 per nn.Linear(1, 50)
    x = jax.random.normal(kx, (B, 1), jnp.float32)

    params = init_params(key)
    padded_params = prepare_params(params)

    out = mlp_extend_forward(x, padded_params)
    out = jax.block_until_ready(out)
    assert out.shape == (B, 1)

    # Tight check vs a reference using the identical bf16/padding strategy.
    ref_bf16 = reference_forward_like_kernel(x, padded_params)
    assert jnp.allclose(out, ref_bf16, atol=1e-4, rtol=1e-4)

    # Loose sanity check vs the pure-f32 PyTorch-equivalent forward.
    ref_f32 = reference_forward_f32(x, params)
    assert jnp.allclose(out, ref_f32, atol=1e-1)

    print("KERNEL_OK")
</pallas_src>

<mosaic_0001>
module attributes {stable_mosaic.version = 11 : i64} {
  func.func @mlp_kernel(%arg0: i32, %arg1: memref<256x1xf32, #tpu.memory_space<vmem>>, %arg2: memref<1x128xf32, #tpu.memory_space<vmem>>, %arg3: memref<1x128xf32, #tpu.memory_space<vmem>>, %arg4: memref<128x128xbf16, #tpu.memory_space<vmem>>, %arg5: memref<1x128xf32, #tpu.memory_space<vmem>>, %arg6: memref<128x128xbf16, #tpu.memory_space<vmem>>, %arg7: memref<1x128xf32, #tpu.memory_space<vmem>>, %arg8: memref<128x128xbf16, #tpu.memory_space<vmem>>, %arg9: memref<1x128xf32, #tpu.memory_space<vmem>>, %arg10: memref<128x128xbf16, #tpu.memory_space<vmem>>, %arg11: memref<1x128xf32, #tpu.memory_space<vmem>>, %arg12: memref<128x128xbf16, #tpu.memory_space<vmem>>, %arg13: memref<1x128xf32, #tpu.memory_space<vmem>>, %arg14: memref<128x128xbf16, #tpu.memory_space<vmem>>, %arg15: memref<1x128xf32, #tpu.memory_space<vmem>>, %arg16: memref<256x128xf32, #tpu.memory_space<vmem>>) attributes {dimension_semantics = [#tpu.dimension_semantics<parallel>], iteration_bounds = array<i64: 2>, scalar_prefetch = 0 : i64, scratch_operands = 0 : i64, tpu.core_type = #tpu.core_type<tc>, window_params = [{transform_indices = @transform_0, window_bounds = array<i64: 256, 1>}, {pipeline_mode = #tpu.pipeline_mode<synchronous>, transform_indices = @transform_1, window_bounds = array<i64: 1, 128>}, {pipeline_mode = #tpu.pipeline_mode<synchronous>, transform_indices = @transform_2, window_bounds = array<i64: 1, 128>}, {pipeline_mode = #tpu.pipeline_mode<synchronous>, transform_indices = @transform_3, window_bounds = array<i64: 128, 128>}, {pipeline_mode = #tpu.pipeline_mode<synchronous>, transform_indices = @transform_4, window_bounds = array<i64: 1, 128>}, {pipeline_mode = #tpu.pipeline_mode<synchronous>, transform_indices = @transform_5, window_bounds = array<i64: 128, 128>}, {pipeline_mode = #tpu.pipeline_mode<synchronous>, transform_indices = @transform_6, window_bounds = array<i64: 1, 128>}, {pipeline_mode = #tpu.pipeline_mode<synchronous>, transform_indices = @transform_7, window_bounds = array<i64: 128, 128>}, {pipeline_mode = #tpu.pipeline_mode<synchronous>, transform_indices = @transform_8, window_bounds = array<i64: 1, 128>}, {pipeline_mode = #tpu.pipeline_mode<synchronous>, transform_indices = @transform_9, window_bounds = array<i64: 128, 128>}, {pipeline_mode = #tpu.pipeline_mode<synchronous>, transform_indices = @transform_10, window_bounds = array<i64: 1, 128>}, {pipeline_mode = #tpu.pipeline_mode<synchronous>, transform_indices = @transform_11, window_bounds = array<i64: 128, 128>}, {pipeline_mode = #tpu.pipeline_mode<synchronous>, transform_indices = @transform_12, window_bounds = array<i64: 1, 128>}, {pipeline_mode = #tpu.pipeline_mode<synchronous>, transform_indices = @transform_13, window_bounds = array<i64: 128, 128>}, {pipeline_mode = #tpu.pipeline_mode<synchronous>, transform_indices = @transform_14, window_bounds = array<i64: 1, 128>}, {transform_indices = @transform_15, window_bounds = array<i64: 256, 128>}]} {
    %c0 = arith.constant 0 : index
    %c0_0 = arith.constant 0 : index
    %0 = vector.load %arg1[%c0, %c0_0] : memref<256x1xf32, #tpu.memory_space<vmem>>, vector<256x1xf32>
    %c0_1 = arith.constant 0 : index
    %c0_2 = arith.constant 0 : index
    %1 = vector.load %arg2[%c0_1, %c0_2] : memref<1x128xf32, #tpu.memory_space<vmem>>, vector<1x128xf32>
    %c0_3 = arith.constant 0 : index
    %c0_4 = arith.constant 0 : index
    %2 = vector.load %arg3[%c0_3, %c0_4] : memref<1x128xf32, #tpu.memory_space<vmem>>, vector<1x128xf32>
    %3 = vector.broadcast %0 : vector<256x1xf32> to vector<256x128xf32>
    %4 = vector.broadcast %1 : vector<1x128xf32> to vector<256x128xf32>
    %5 = arith.mulf %3, %4 : vector<256x128xf32>
    %6 = vector.broadcast %2 : vector<1x128xf32> to vector<256x128xf32>
    %7 = arith.addf %5, %6 : vector<256x128xf32>
    %cst = arith.constant 0.000000e+00 : f32
    %8 = vector.broadcast %cst : f32 to vector<256x128xf32>
    %9 = arith.maximumf %7, %8 : vector<256x128xf32>
    %c0_5 = arith.constant 0 : index
    %c0_6 = arith.constant 0 : index
    %10 = vector.load %arg4[%c0_5, %c0_6] : memref<128x128xbf16, #tpu.memory_space<vmem>>, vector<128x128xbf16>
    %c0_7 = arith.constant 0 : index
    %c0_8 = arith.constant 0 : index
    %11 = vector.load %arg5[%c0_7, %c0_8] : memref<1x128xf32, #tpu.memory_space<vmem>>, vector<1x128xf32>
    %12 = arith.truncf %9 : vector<256x128xf32> to vector<256x128xbf16>
    %cst_9 = arith.constant dense<0.000000e+00> : vector<256x128xf32>
    %13 = tpu.matmul %12, %10, %cst_9 {dimension_numbers = #tpu.dot_dimension_numbers<[1], [0], [0], [1], [0, 0, 1, 1], [], []>} : vector<256x128xbf16>, vector<128x128xbf16>, vector<256x128xf32> -> vector<256x128xf32>
    %14 = vector.broadcast %11 : vector<1x128xf32> to vector<256x128xf32>
    %15 = arith.addf %13, %14 : vector<256x128xf32>
    %cst_10 = arith.constant 0.000000e+00 : f32
    %16 = vector.broadcast %cst_10 : f32 to vector<256x128xf32>
    %17 = arith.maximumf %15, %16 : vector<256x128xf32>
    %c0_11 = arith.constant 0 : index
    %c0_12 = arith.constant 0 : index
    %18 = vector.load %arg6[%c0_11, %c0_12] : memref<128x128xbf16, #tpu.memory_space<vmem>>, vector<128x128xbf16>
    %c0_13 = arith.constant 0 : index
    %c0_14 = arith.constant 0 : index
    %19 = vector.load %arg7[%c0_13, %c0_14] : memref<1x128xf32, #tpu.memory_space<vmem>>, vector<1x128xf32>
    %20 = arith.truncf %17 : vector<256x128xf32> to vector<256x128xbf16>
    %cst_15 = arith.constant dense<0.000000e+00> : vector<256x128xf32>
    %21 = tpu.matmul %20, %18, %cst_15 {dimension_numbers = #tpu.dot_dimension_numbers<[1], [0], [0], [1], [0, 0, 1, 1], [], []>} : vector<256x128xbf16>, vector<128x128xbf16>, vector<256x128xf32> -> vector<256x128xf32>
    %22 = vector.broadcast %19 : vector<1x128xf32> to vector<256x128xf32>
    %23 = arith.addf %21, %22 : vector<256x128xf32>
    %cst_16 = arith.constant 0.000000e+00 : f32
    %24 = vector.broadcast %cst_16 : f32 to vector<256x128xf32>
    %25 = arith.maximumf %23, %24 : vector<256x128xf32>
    %c0_17 = arith.constant 0 : index
    %c0_18 = arith.constant 0 : index
    %26 = vector.load %arg8[%c0_17, %c0_18] : memref<128x128xbf16, #tpu.memory_space<vmem>>, vector<128x128xbf16>
    %c0_19 = arith.constant 0 : index
    %c0_20 = arith.constant 0 : index
    %27 = vector.load %arg9[%c0_19, %c0_20] : memref<1x128xf32, #tpu.memory_space<vmem>>, vector<1x128xf32>
    %28 = arith.truncf %25 : vector<256x128xf32> to vector<256x128xbf16>
    %cst_21 = arith.constant dense<0.000000e+00> : vector<256x128xf32>
    %29 = tpu.matmul %28, %26, %cst_21 {dimension_numbers = #tpu.dot_dimension_numbers<[1], [0], [0], [1], [0, 0, 1, 1], [], []>} : vector<256x128xbf16>, vector<128x128xbf16>, vector<256x128xf32> -> vector<256x128xf32>
    %30 = vector.broadcast %27 : vector<1x128xf32> to vector<256x128xf32>
    %31 = arith.addf %29, %30 : vector<256x128xf32>
    %cst_22 = arith.constant 0.000000e+00 : f32
    %32 = vector.broadcast %cst_22 : f32 to vector<256x128xf32>
    %33 = arith.maximumf %31, %32 : vector<256x128xf32>
    %c0_23 = arith.constant 0 : index
    %c0_24 = arith.constant 0 : index
    %34 = vector.load %arg10[%c0_23, %c0_24] : memref<128x128xbf16, #tpu.memory_space<vmem>>, vector<128x128xbf16>
    %c0_25 = arith.constant 0 : index
    %c0_26 = arith.constant 0 : index
    %35 = vector.load %arg11[%c0_25, %c0_26] : memref<1x128xf32, #tpu.memory_space<vmem>>, vector<1x128xf32>
    %36 = arith.truncf %33 : vector<256x128xf32> to vector<256x128xbf16>
    %cst_27 = arith.constant dense<0.000000e+00> : vector<256x128xf32>
    %37 = tpu.matmul %36, %34, %cst_27 {dimension_numbers = #tpu.dot_dimension_numbers<[1], [0], [0], [1], [0, 0, 1, 1], [], []>} : vector<256x128xbf16>, vector<128x128xbf16>, vector<256x128xf32> -> vector<256x128xf32>
    %38 = vector.broadcast %35 : vector<1x128xf32> to vector<256x128xf32>
    %39 = arith.addf %37, %38 : vector<256x128xf32>
    %cst_28 = arith.constant 0.000000e+00 : f32
    %40 = vector.broadcast %cst_28 : f32 to vector<256x128xf32>
    %41 = arith.maximumf %39, %40 : vector<256x128xf32>
    %c0_29 = arith.constant 0 : index
    %c0_30 = arith.constant 0 : index
    %42 = vector.load %arg12[%c0_29, %c0_30] : memref<128x128xbf16, #tpu.memory_space<vmem>>, vector<128x128xbf16>
    %c0_31 = arith.constant 0 : index
    %c0_32 = arith.constant 0 : index
    %43 = vector.load %arg13[%c0_31, %c0_32] : memref<1x128xf32, #tpu.memory_space<vmem>>, vector<1x128xf32>
    %44 = arith.truncf %41 : vector<256x128xf32> to vector<256x128xbf16>
    %cst_33 = arith.constant dense<0.000000e+00> : vector<256x128xf32>
    %45 = tpu.matmul %44, %42, %cst_33 {dimension_numbers = #tpu.dot_dimension_numbers<[1], [0], [0], [1], [0, 0, 1, 1], [], []>} : vector<256x128xbf16>, vector<128x128xbf16>, vector<256x128xf32> -> vector<256x128xf32>
    %46 = vector.broadcast %43 : vector<1x128xf32> to vector<256x128xf32>
    %47 = arith.addf %45, %46 : vector<256x128xf32>
    %cst_34 = arith.constant 0.000000e+00 : f32
    %48 = vector.broadcast %cst_34 : f32 to vector<256x128xf32>
    %49 = arith.maximumf %47, %48 : vector<256x128xf32>
    %c0_35 = arith.constant 0 : index
    %c0_36 = arith.constant 0 : index
    %50 = vector.load %arg14[%c0_35, %c0_36] : memref<128x128xbf16, #tpu.memory_space<vmem>>, vector<128x128xbf16>
    %c0_37 = arith.constant 0 : index
    %c0_38 = arith.constant 0 : index
    %51 = vector.load %arg15[%c0_37, %c0_38] : memref<1x128xf32, #tpu.memory_space<vmem>>, vector<1x128xf32>
    %52 = arith.truncf %49 : vector<256x128xf32> to vector<256x128xbf16>
    %cst_39 = arith.constant dense<0.000000e+00> : vector<256x128xf32>
    %53 = tpu.matmul %52, %50, %cst_39 {dimension_numbers = #tpu.dot_dimension_numbers<[1], [0], [0], [1], [0, 0, 1, 1], [], []>} : vector<256x128xbf16>, vector<128x128xbf16>, vector<256x128xf32> -> vector<256x128xf32>
    %54 = vector.broadcast %51 : vector<1x128xf32> to vector<256x128xf32>
    %55 = arith.addf %53, %54 : vector<256x128xf32>
    %56 = arith.negf %55 : vector<256x128xf32>
    %57 = math.exp %56 : vector<256x128xf32>
    %cst_40 = arith.constant 1.000000e+00 : f32
    %58 = vector.broadcast %cst_40 : f32 to vector<256x128xf32>
    %59 = arith.addf %58, %57 : vector<256x128xf32>
    %60 = arith.divf %58, %59 : vector<256x128xf32>
    %c0_41 = arith.constant 0 : index
    %c0_42 = arith.constant 0 : index
    %61 = vector.load %arg16[%c0_41, %c0_42] : memref<256x128xf32, #tpu.memory_space<vmem>>, vector<256x128xf32>
    tpu.vector_store %arg16[%c0_41, %c0_42], %60 {strides = array<i32>} : memref<256x128xf32, #tpu.memory_space<vmem>>, vector<256x128xf32>,
    return
  }
  func.func @transform_0(%arg0: i32) -> (i32, i32) {
    %c0_i32 = arith.constant 0 : i32
    %c0_i32_0 = arith.constant 0 : i32
    return %arg0, %c0_i32 : i32, i32
  }
  func.func @transform_1(%arg0: i32) -> (i32, i32) {
    %c0_i32 = arith.constant 0 : i32
    %c0_i32_0 = arith.constant 0 : i32
    %c0_i32_1 = arith.constant 0 : i32
    return %c0_i32, %c0_i32_0 : i32, i32
  }
  func.func @transform_2(%arg0: i32) -> (i32, i32) {
    %c0_i32 = arith.constant 0 : i32
    %c0_i32_0 = arith.constant 0 : i32
    %c0_i32_1 = arith.constant 0 : i32
    return %c0_i32, %c0_i32_0 : i32, i32
  }
  func.func @transform_3(%arg0: i32) -> (i32, i32) {
    %c0_i32 = arith.constant 0 : i32
    %c0_i32_0 = arith.constant 0 : i32
    %c0_i32_1 = arith.constant 0 : i32
    return %c0_i32, %c0_i32_0 : i32, i32
  }
  func.func @transform_4(%arg0: i32) -> (i32, i32) {
    %c0_i32 = arith.constant 0 : i32
    %c0_i32_0 = arith.constant 0 : i32
    %c0_i32_1 = arith.constant 0 : i32
    return %c0_i32, %c0_i32_0 : i32, i32
  }
  func.func @transform_5(%arg0: i32) -> (i32, i32) {
    %c0_i32 = arith.constant 0 : i32
    %c0_i32_0 = arith.constant 0 : i32
    %c0_i32_1 = arith.constant 0 : i32
    return %c0_i32, %c0_i32_0 : i32, i32
  }
  func.func @transform_6(%arg0: i32) -> (i32, i32) {
    %c0_i32 = arith.constant 0 : i32
    %c0_i32_0 = arith.constant 0 : i32
    %c0_i32_1 = arith.constant 0 : i32
    return %c0_i32, %c0_i32_0 : i32, i32
  }
  func.func @transform_7(%arg0: i32) -> (i32, i32) {
    %c0_i32 = arith.constant 0 : i32
    %c0_i32_0 = arith.constant 0 : i32
    %c0_i32_1 = arith.constant 0 : i32
    return %c0_i32, %c0_i32_0 : i32, i32
  }
  func.func @transform_8(%arg0: i32) -> (i32, i32) {
    %c0_i32 = arith.constant 0 : i32
    %c0_i32_0 = arith.constant 0 : i32
    %c0_i32_1 = arith.constant 0 : i32
    return %c0_i32, %c0_i32_0 : i32, i32
  }
  func.func @transform_9(%arg0: i32) -> (i32, i32) {
    %c0_i32 = arith.constant 0 : i32
    %c0_i32_0 = arith.constant 0 : i32
    %c0_i32_1 = arith.constant 0 : i32
    return %c0_i32, %c0_i32_0 : i32, i32
  }
  func.func @transform_10(%arg0: i32) -> (i32, i32) {
    %c0_i32 = arith.constant 0 : i32
    %c0_i32_0 = arith.constant 0 : i32
    %c0_i32_1 = arith.constant 0 : i32
    return %c0_i32, %c0_i32_0 : i32, i32
  }
  func.func @transform_11(%arg0: i32) -> (i32, i32) {
    %c0_i32 = arith.constant 0 : i32
    %c0_i32_0 = arith.constant 0 : i32
    %c0_i32_1 = arith.constant 0 : i32
    return %c0_i32, %c0_i32_0 : i32, i32
  }
  func.func @transform_12(%arg0: i32) -> (i32, i32) {
    %c0_i32 = arith.constant 0 : i32
    %c0_i32_0 = arith.constant 0 : i32
    %c0_i32_1 = arith.constant 0 : i32
    return %c0_i32, %c0_i32_0 : i32, i32
  }
  func.func @transform_13(%arg0: i32) -> (i32, i32) {
    %c0_i32 = arith.constant 0 : i32
    %c0_i32_0 = arith.constant 0 : i32
    %c0_i32_1 = arith.constant 0 : i32
    return %c0_i32, %c0_i32_0 : i32, i32
  }
  func.func @transform_14(%arg0: i32) -> (i32, i32) {
    %c0_i32 = arith.constant 0 : i32
    %c0_i32_0 = arith.constant 0 : i32
    %c0_i32_1 = arith.constant 0 : i32
    return %c0_i32, %c0_i32_0 : i32, i32
  }
  func.func @transform_15(%arg0: i32) -> (i32, i32) {
    %c0_i32 = arith.constant 0 : i32
    %c0_i32_0 = arith.constant 0 : i32
    return %arg0, %c0_i32 : i32, i32
  }
}

</mosaic_0001>

<bundles_post_ra>
// kernel: mlp_extend_forward.1
= control target key start
LH: loop header
LB: loop body
LE: loop exit
PB: predicated region body
PF: predicated region fallthrough
CT: control target
= control target key end

     0   :  { %s3225_s18 = smov 0   ;;  %s3777_s0 = inlined_call_operand.vmem [shape: f32[512,1], index: 0, kind: input, shape index: {}]   ;;  %s3778_s1 = inlined_call_operand.vmem [shape: f32[1,128], index: 1, kind: input, shape index: {}]   ;;  %s3779_s2 = inlined_call_operand.vmem [shape: f32[1,128], index: 2, kind: input, shape index: {}]   ;;  %s3780_s3 = inlined_call_operand.vmem [shape: bf16[128,128], index: 3, kind: input, shape index: {}]   ;;  %s3781_s4 = inlined_call_operand.vmem [shape: f32[1,128], index: 4, kind: input, shape index: {}]   ;;  %s3782_s5 = inlined_call_operand.vmem [shape: bf16[128,128], index: 5, kind: input, shape index: {}]   ;;  %s3783_s6 = inlined_call_operand.vmem [shape: f32[1,128], index: 6, kind: input, shape index: {}]   ;;  %s3784_s7 = inlined_call_operand.vmem [shape: bf16[128,128], index: 7, kind: input, shape index: {}]   ;;  %s3785_s8 = inlined_call_operand.vmem [shape: f32[1,128], index: 8, kind: input, shape index: {}]   ;;  %s3786_s9 = inlined_call_operand.vmem [shape: bf16[128,128], index: 9, kind: input, shape index: {}]   ;;  %s3787_s10 = inlined_call_operand.vmem [shape: f32[1,128], index: 10, kind: input, shape index: {}]   ;;  %s3788_s11 = inlined_call_operand.vmem [shape: bf16[128,128], index: 11, kind: input, shape index: {}]   ;;  %s3789_s12 = inlined_call_operand.vmem [shape: f32[1,128], index: 12, kind: input, shape index: {}]   ;;  %s3790_s13 = inlined_call_operand.vmem [shape: bf16[128,128], index: 13, kind: input, shape index: {}]   ;;  %s3791_s14 = inlined_call_operand.vmem [shape: f32[1,128], index: 14, kind: input, shape index: {}]   ;;  %s3792_s15 = inlined_call_operand.vmem [shape: f32[512,128], index: 15, kind: output, shape index: {}]  }
   0x1 LB: > { %s2688_s19 = sadd.s32 4294967295, %s3142_s18   ;;  %p2692_p0 = scmp.ge.s32.totalorder %s3142_s18, 1  ;;  %s3142_s18 = sphi %s3225_s18, %s25_s18  }
   0x2   : > { %p438_p1 = scmp.lt.s32.totalorder %s3142_s18, 3 }
   0x4   : > { %p439_p2 = pnand %p2692_p0, %p438_p1 }
   0x5   : > { %s2693_s20 = sshll.u32 (!%p439_p2), %s2688_s19, 5 }
   0x6   : > { %442 = sbr.rel (%p439_p2) target bundleno = 1264 (0x4f0), region = 80  ;;  %p487_p3 = scmp.lt.s32.totalorder (!%p439_p2), %s2693_s20, 63 }
   0xb   : > { %v3144_v0 = vmov 0   ;;  %s3794_s20 = smov (!%p487_p3, %s2693_s20), 63  ;;  %v2930_v28 = vld [vmem:[%s3780_s3 + $0x38] sm:$0xff]  ;;  %v2929_v32 = vld [vmem:[%s3780_s3 + $0x30] sm:$0xff]  ;;  %v2928_v33 = vld [vmem:[%s3780_s3 + $0x28] sm:$0xff] }
   0xc   : > { %2998 = vset.pattern.permute.xlu2 %v3144_v0  ;;  %2997 = vset.pattern.permute.xlu1 %v3144_v0  ;;  %s2694_s21 = sshll.u32 %s3794_s20, 3  ;;  %v2927_v36 = vld [vmem:[%s3780_s3 + $0x20] sm:$0xff]  ;;  %v2926_v37 = vld [vmem:[%s3780_s3 + $0x18] sm:$0xff]  ;;  %v2925_v38 = vld [vmem:[%s3780_s3 + $0x10] sm:$0xff] }
   0xd   : > { %2996 = vset.pattern.permute.xlu0 %v3144_v0  ;;  %s3241_s24 = scalar_lea.vmem %s3777_s0, %s2694_s21  ;;  %878 = vmatpush.bf16.msra.mxu0 %v2930_v28  ;;  %v2924_v39 = vld [vmem:[%s3780_s3 + $0x8] sm:$0xff]  ;;  %v2923_v40 = vld [vmem:[%s3780_s3] sm:$0xff]  ;;  %s3695_s16 = scalar_lea.vmem %s3792_s15, %s2694_s21 }
   0xe   : > { %v502_v1 = vld [vmem:[%s3241_s24 + $0x20] sm:$0xff]  ;;  %v500_v2 = vld [vmem:[%s3241_s24 + $0x10] sm:$0xff]  ;;  %v503_v4 = vld [vmem:[%s3241_s24 + $0x28] sm:$0xff]  ;;  %2971 = vmatpush.bf16.msra.mxu2 %v2930_v28 }
   0xf   : > { %v498_v3 = vld [vmem:[%s3241_s24] sm:$0xff]  ;;  %554 = vperm.xlu2 %2998, %v502_v1   ;;  %544 = vperm.xlu1 %2997, %v500_v2   ;;  %v501_v5 = vld [vmem:[%s3241_s24 + $0x18] sm:$0xff]  ;;  %v499_v6 = vld [vmem:[%s3241_s24 + $0x8] sm:$0xff] }
  0x10   : > { %534 = vperm.xlu0 %2996, %v498_v3   ;;  %v506_v7 = vld [vmem:[%s3241_s24 + $0x40] sm:$0xff]  ;;  %v505_v8 = vld [vmem:[%s3241_s24 + $0x38] sm:$0xff]  ;;  %v504_v9 = vld [vmem:[%s3241_s24 + $0x30] sm:$0xff] }
  0x11   : > { %v509_v10 = vld [vmem:[%s3241_s24 + $0x58] sm:$0xff]  ;;  %v508_v11 = vld [vmem:[%s3241_s24 + $0x50] sm:$0xff]  ;;  %v507_v12 = vld [vmem:[%s3241_s24 + $0x48] sm:$0xff]  ;;  %879 = vmatpush.bf16.msra.mxu0 %v2929_v32 }
  0x12   : > { %v512_v13 = vld [vmem:[%s3241_s24 + $0x70] sm:$0xff]  ;;  %v511_v14 = vld [vmem:[%s3241_s24 + $0x68] sm:$0xff]  ;;  %v510_v15 = vld [vmem:[%s3241_s24 + $0x60] sm:$0xff]  ;;  %2972 = vmatpush.bf16.msra.mxu2 %v2929_v32 }
  0x13   : > { %v515_v16 = vld [vmem:[%s3241_s24 + $0x88] sm:$0xff]  ;;  %v514_v17 = vld [vmem:[%s3241_s24 + $0x80] sm:$0xff]  ;;  %v513_v18 = vld [vmem:[%s3241_s24 + $0x78] sm:$0xff] }
  0x14   : > { %v518_v19 = vld [vmem:[%s3241_s24 + $0xa0] sm:$0xff]  ;;  %v517_v20 = vld [vmem:[%s3241_s24 + $0x98] sm:$0xff]  ;;  %v516_v21 = vld [vmem:[%s3241_s24 + $0x90] sm:$0xff] }
  0x15   : > { %v521_v22 = vld [vmem:[%s3241_s24 + $0xb8] sm:$0xff]  ;;  %v520_v23 = vld [vmem:[%s3241_s24 + $0xb0] sm:$0xff]  ;;  %v519_v24 = vld [vmem:[%s3241_s24 + $0xa8] sm:$0xff]  ;;  %880 = vmatpush.bf16.msra.mxu0 %v2928_v33 }
  0x16   : > { %v524_v25 = vld [vmem:[%s3241_s24 + $0xd0] sm:$0xff]  ;;  %v523_v26 = vld [vmem:[%s3241_s24 + $0xc8] sm:$0xff]  ;;  %v522_v27 = vld [vmem:[%s3241_s24 + $0xc0] sm:$0xff]  ;;  %2973 = vmatpush.bf16.msra.mxu2 %v2928_v33 }
  0x17   : > { %559 = vperm.xlu2 %2998, %v503_v4   ;;  %549 = vperm.xlu1 %2997, %v501_v5   ;;  %v527_v29 = vld [vmem:[%s3241_s24 + $0xe8] sm:$0xff]  ;;  %v526_v30 = vld [vmem:[%s3241_s24 + $0xe0] sm:$0xff]  ;;  %v525_v31 = vld [vmem:[%s3241_s24 + $0xd8] sm:$0xff] }
  0x18   : > { %539 = vperm.xlu0 %2996, %v499_v6   ;;  %v529_v34 = vld [vmem:[%s3241_s24 + $0xf8] sm:$0xff]  ;;  %v528_v35 = vld [vmem:[%s3241_s24 + $0xf0] sm:$0xff]  ;;  %v3302_v45 = vld [vmem:[%s3778_s1] ss:$0 sm:$0xff] }
  0x19   : > { %881 = vmatpush.bf16.msra.mxu0 %v2927_v36  ;;  %v3307_v46 = vld [vmem:[%s3779_s2] ss:$0 sm:$0xff] }
  0x1a   : > { %2974 = vmatpush.bf16.msra.mxu2 %v2927_v36 }
  0x1d   : > { %882 = vmatpush.bf16.msra.mxu0 %v2926_v37 }
  0x1e   : > { %2975 = vmatpush.bf16.msra.mxu2 %v2926_v37 }
  0x1f   : > { %574 = vperm.xlu2 %2998, %v506_v7   ;;  %569 = vperm.xlu1 %2997, %v505_v8  }
  0x20   : > { %564 = vperm.xlu0 %2996, %v504_v9  }
  0x21   : > { %883 = vmatpush.bf16.msra.mxu0 %v2925_v38 }
  0x22   : > { %2976 = vmatpush.bf16.msra.mxu2 %v2925_v38 }
  0x25   : > { %884 = vmatpush.bf16.msra.mxu0 %v2924_v39 }
  0x26   : > { %2977 = vmatpush.bf16.msra.mxu2 %v2924_v39 }
  0x27   : > { %589 = vperm.xlu2 %2998, %v509_v10   ;;  %584 = vperm.xlu1 %2997, %v508_v11  }
  0x28   : > { %579 = vperm.xlu0 %2996, %v507_v12  }
  0x29   : > { %885 = vmatpush.bf16.msra.mxu0 %v2923_v40 }
  0x2a   : > { %2978 = vmatpush.bf16.msra.mxu2 %v2923_v40 }
  0x2f   : > { %604 = vperm.xlu2 %2998, %v512_v13   ;;  %599 = vperm.xlu1 %2997, %v511_v14  }
  0x30   : > { %594 = vperm.xlu0 %2996, %v510_v15  }
  0x37   : > { %619 = vperm.xlu2 %2998, %v515_v16   ;;  %614 = vperm.xlu1 %2997, %v514_v17  }
  0x38   : > { %609 = vperm.xlu0 %2996, %v513_v18  }
  0x3f   : > { %634 = vperm.xlu2 %2998, %v518_v19   ;;  %629 = vperm.xlu1 %2997, %v517_v20  }
  0x40   : > { %624 = vperm.xlu0 %2996, %v516_v21  }
  0x47   : > { %649 = vperm.xlu2 %2998, %v521_v22   ;;  %644 = vperm.xlu1 %2997, %v520_v23  }
  0x48   : > { %639 = vperm.xlu0 %2996, %v519_v24  }
  0x4f   : > { %664 = vperm.xlu2 %2998, %v524_v25   ;;  %659 = vperm.xlu1 %2997, %v523_v26  }
  0x50   : > { %654 = vperm.xlu0 %2996, %v522_v27  }
  0x57   : > { %679 = vperm.xlu2 %2998, %v527_v29   ;;  %674 = vperm.xlu1 %2997, %v526_v30  }
  0x58   : > { %669 = vperm.xlu0 %2996, %v525_v31  }
  0x5f   : > { %689 = vperm.xlu1 %2997, %v529_v34  }
  0x60   : > { %684 = vperm.xlu0 %2996, %v528_v35  }
  0x69   : > { %v555_v41 = vpop.permute.xlu2 %554 }
  0x6a   : > { %v699_v18 = vmul.f32 %v3302_v45, %v555_v41 }
  0x6c   : > { %v734_v26 = vadd.f32 %v3307_v46, %v699_v18 }
  0x6e   : > { %v766_v36 = vmax.f32 %v734_v26, 0.0 }
  0x71   : > { %v560_v42 = vpop.permute.xlu2 %559 }
  0x72   : > { %v700_v19 = vmul.f32 %v3302_v45, %v560_v42 }
  0x74   : > { %v735_v27 = vadd.f32 %v3307_v46, %v700_v19 }
  0x76   : > { %v767_v37 = vmax.f32 %v735_v27, 0.0 }
  0x79   : > { %v3309_v47 = vpop.permute.xlu2 %574 }
  0x81   : > { %v545_v43 = vpop.permute.xlu1 %544  ;;  %v590_v56 = vpop.permute.xlu2 %589 }
  0x82   : > { %v535_v44 = vpop.permute.xlu0 %534  ;;  %v706_v60 = vmul.f32 %v3302_v45, %v590_v56  ;;  %v697_v61 = vmul.f32 %v3302_v45, %v545_v43 }
  0x83   : > { %v695_v48 = vmul.f32 %v3302_v45, %v535_v44 }
  0x84   : > { %v741_v63 = vadd.f32 %v3307_v46, %v706_v60  ;;  %v732_v0 = vadd.f32 %v3307_v46, %v697_v61 }
  0x85   : > { %v730_v51 = vadd.f32 %v3307_v46, %v695_v48  ;;  %v813_v48 = vpack.c.bf16 %v767_v37, %v766_v36  ;;  %v2935_v36 = vld [vmem:[%s3782_s5 + $0x20] sm:$0xff] }
  0x86   : > { %v773_v6 = vmax.f32 %v741_v63, 0.0  ;;  %v764_v8 = vmax.f32 %v732_v0, 0.0 }
  0x87   : > { %v762_v54 = vmax.f32 %v730_v51, 0.0 }
  0x89   : > { %v550_v49 = vpop.permute.xlu1 %549  ;;  %v605_v5 = vpop.permute.xlu2 %604 }
  0x8a   : > { %v540_v50 = vpop.permute.xlu0 %539  ;;  %v698_v62 = vmul.f32 %v3302_v45, %v550_v49  ;;  %v709_v24 = vmul.f32 %v3302_v45, %v605_v5 }
  0x8b   : > { %v696_v52 = vmul.f32 %v3302_v45, %v540_v50 }
  0x8c   : > { %v733_v1 = vadd.f32 %v3307_v46, %v698_v62  ;;  %v744_v33 = vadd.f32 %v3307_v46, %v709_v24 }
  0x8d   : > { %v731_v53 = vadd.f32 %v3307_v46, %v696_v52 }
  0x8e   : > { %v765_v9 = vmax.f32 %v733_v1, 0.0  ;;  %v776_v41 = vmax.f32 %v744_v33, 0.0  ;;  %v2936_v33 = vld [vmem:[%s3782_s5 + $0x28] sm:$0xff] }
  0x8f   : > { %v763_v55 = vmax.f32 %v731_v53, 0.0 }
  0x90   : > { %v812_v13 = vpack.c.bf16 %v765_v9, %v764_v8 }
  0x91   : > { %v570_v57 = vpop.permute.xlu1 %569  ;;  %v811_v58 = vpack.c.bf16 %v763_v55, %v762_v54  ;;  %v620_v20 = vpop.permute.xlu2 %619 }
  0x92   : > { %v565_v59 = vpop.permute.xlu0 %564  ;;  %v712_v22 = vmul.f32 %v3302_v45, %v620_v20  ;;  %v702_v53 = vmul.f32 %v3302_v45, %v570_v57 }
  0x93   : > { %886 = vmatmul.bf16.vlgmr.msra.gmra.mxu0 %v811_v58  ;;  %v701_v54 = vmul.f32 %v3302_v45, %v565_v59  ;;  %v703_v59 = vmul.f32 %v3302_v45, %v3309_v47 }
  0x94   : > { %v747_v30 = vadd.f32 %v3307_v46, %v712_v22  ;;  %v737_v58 = vadd.f32 %v3307_v46, %v702_v53 }
  0x95   : > { %v736_v60 = vadd.f32 %v3307_v46, %v701_v54  ;;  %v738_v9 = vadd.f32 %v3307_v46, %v703_v59 }
  0x96   : > { %v779_v39 = vmax.f32 %v747_v30, 0.0  ;;  %v769_v63 = vmax.f32 %v737_v58, 0.0  ;;  %v2937_v30 = vld [vmem:[%s3782_s5 + $0x30] sm:$0xff] }
  0x97   : > { %v768_v0 = vmax.f32 %v736_v60, 0.0 }
  0x99   : > { %v585_v2 = vpop.permute.xlu1 %584  ;;  %v635_v5 = vpop.permute.xlu2 %634 }
  0x9a   : > { %v705_v3 = vmul.f32 %v3302_v45, %v585_v2  ;;  %v3322_v4 = vpop.permute.xlu0 %579 }
  0x9c   : > { %v740_v7 = vadd.f32 %v3307_v46, %v705_v3  ;;  %v814_v3 = vpack.c.bf16 %v769_v63, %v768_v0  ;;  %v2946_v63 = vld [vmem:[%s3784_s7 + $0x38] sm:$0xff] }
  0x9d   : > { %1288 = vmatpush.bf16.msrb.mxu2 %v2946_v63 }
  0x9e   : > { %v772_v10 = vmax.f32 %v740_v7, 0.0  ;;  %v715_v7 = vmul.f32 %v3302_v45, %v635_v5 }
  0xa0   : > { %v3325_v11 = vpack.c.bf16 %v773_v6, %v772_v10  ;;  %v704_v6 = vmul.f32 %v3302_v45, %v3322_v4  ;;  %v2938_v4 = vld [vmem:[%s3782_s5 + $0x38] sm:$0xff] }
  0xa1   : > { %v600_v12 = vpop.permute.xlu1 %599  ;;  %v650_v19 = vpop.permute.xlu2 %649  ;;  %1083 = vmatpush.bf16.msra.mxu1 %v2938_v4  ;;  %2979 = vmatpush.bf16.msra.mxu3 %v2938_v4 }
  0xa2   : > { %v708_v14 = vmul.f32 %v3302_v45, %v600_v12  ;;  %v595_v15 = vpop.permute.xlu0 %594  ;;  %v739_v10 = vadd.f32 %v3307_v46, %v704_v6  ;;  %v750_v12 = vadd.f32 %v3307_v46, %v715_v7 }
  0xa3   : > { %v707_v16 = vmul.f32 %v3302_v45, %v595_v15  ;;  %891 = vmatmul.bf16.gmra.mxu0 %v812_v13 }
  0xa4   : > { %v743_v17 = vadd.f32 %v3307_v46, %v708_v14  ;;  %v770_v14 = vmax.f32 %v738_v9, 0.0  ;;  %v771_v15 = vmax.f32 %v739_v10, 0.0 }
  0xa5   : > { %v742_v21 = vadd.f32 %v3307_v46, %v707_v16  ;;  %v782_v16 = vmax.f32 %v750_v12, 0.0  ;;  %1084 = vmatpush.bf16.msra.mxu1 %v2937_v30  ;;  %2980 = vmatpush.bf16.msra.mxu3 %v2937_v30 }
  0xa6   : > { %v775_v23 = vmax.f32 %v743_v17, 0.0  ;;  %v815_v18 = vpack.c.bf16 %v771_v15, %v770_v14  ;;  %v2945_v15 = vld [vmem:[%s3784_s7 + $0x30] sm:$0xff] }
  0xa7   : > { %v774_v25 = vmax.f32 %v742_v21, 0.0  ;;  %v718_v21 = vmul.f32 %v3302_v45, %v650_v19  ;;  %1289 = vmatpush.bf16.msrb.mxu2 %v2945_v15 }
  0xa9   : > { %v615_v28 = vpop.permute.xlu1 %614  ;;  %v3337_v29 = vpack.c.bf16 %v775_v23, %v774_v25  ;;  %v753_v23 = vadd.f32 %v3307_v46, %v718_v21  ;;  %1085 = vmatpush.bf16.msra.mxu1 %v2936_v33  ;;  %2981 = vmatpush.bf16.msra.mxu3 %v2936_v33 }
  0xaa   : > { %v711_v31 = vmul.f32 %v3302_v45, %v615_v28  ;;  %v610_v32 = vpop.permute.xlu0 %609 }
  0xab   : > { %v710_v34 = vmul.f32 %v3302_v45, %v610_v32  ;;  %v785_v25 = vmax.f32 %v753_v23, 0.0 }
  0xac   : > { %v746_v35 = vadd.f32 %v3307_v46, %v711_v31 }
  0xad   : > { %v745_v38 = vadd.f32 %v3307_v46, %v710_v34  ;;  %1086 = vmatpush.bf16.msra.mxu1 %v2935_v36  ;;  %2982 = vmatpush.bf16.msra.mxu3 %v2935_v36 }
  0xae   : > { %v778_v40 = vmax.f32 %v746_v35, 0.0 }
  0xaf   : > { %v777_v42 = vmax.f32 %v745_v38, 0.0  ;;  %v2934_v38 = vld [vmem:[%s3782_s5 + $0x18] sm:$0xff] }
  0xb0   : > { %v819_v43 = vpack.c.bf16 %v779_v39, %v778_v40 }
  0xb1   : > { %v630_v44 = vpop.permute.xlu1 %629  ;;  %v3345_v49 = vpack.c.bf16 %v777_v42, %v776_v41  ;;  %1087 = vmatpush.bf16.msra.mxu1 %v2934_v38  ;;  %2983 = vmatpush.bf16.msra.mxu3 %v2934_v38  ;;  %v2933_v41 = vld [vmem:[%s3782_s5 + $0x10] sm:$0xff]  ;;  %v665_v42 = vpop.permute.xlu2 %664 }
  0xb2   : > { %v625_v50 = vpop.permute.xlu0 %624  ;;  %926 = vmatmul.bf16.vlgmr.msra.gmra.mxu2 %v819_v43  ;;  %v714_v51 = vmul.f32 %v3302_v45, %v630_v44  ;;  %v721_v44 = vmul.f32 %v3302_v45, %v665_v42 }
  0xb3   : > { %896 = vmatmul.bf16.gmra.mxu0 %v813_v48  ;;  %v713_v52 = vmul.f32 %v3302_v45, %v625_v50  ;;  %v2932_v48 = vld [vmem:[%s3782_s5 + $0x8] sm:$0xff] }
  0xb4   : > { %v749_v55 = vadd.f32 %v3307_v46, %v714_v51  ;;  %v756_v51 = vadd.f32 %v3307_v46, %v721_v44 }
  0xb5   : > { %v748_v56 = vadd.f32 %v3307_v46, %v713_v52  ;;  %1088 = vmatpush.bf16.msra.mxu1 %v2933_v41  ;;  %2984 = vmatpush.bf16.msra.mxu3 %v2933_v41 }
  0xb6   : > { %v781_v61 = vmax.f32 %v749_v55, 0.0  ;;  %v788_v53 = vmax.f32 %v756_v51, 0.0 }
  0xb7   : > { %v780_v62 = vmax.f32 %v748_v56, 0.0 }
  0xb9   : > { %v820_v1 = vpack.c.bf16 %v781_v61, %v780_v62  ;;  %v645_v47 = vpop.permute.xlu1 %644  ;;  %1089 = vmatpush.bf16.msra.mxu1 %v2932_v48  ;;  %2985 = vmatpush.bf16.msra.mxu3 %v2932_v48  ;;  %v680_v56 = vpop.permute.xlu2 %679 }
  0xba   : > { %v640_v2 = vpop.permute.xlu0 %639  ;;  %v717_v20 = vmul.f32 %v3302_v45, %v645_v47  ;;  %v724_v60 = vmul.f32 %v3302_v45, %v680_v56 }
  0xbb   : > { %v716_v57 = vmul.f32 %v3302_v45, %v640_v2 }
  0xbc   : > { %v752_v22 = vadd.f32 %v3307_v46, %v717_v20  ;;  %v759_v62 = vadd.f32 %v3307_v46, %v724_v60 }
  0xbd   : > { %v751_v8 = vadd.f32 %v3307_v46, %v716_v57 }
  0xbe   : > { %v784_v24 = vmax.f32 %v752_v22, 0.0  ;;  %v2944_v22 = vld [vmem:[%s3784_s7 + $0x28] sm:$0xff] }
  0xbf   : > { %v783_v13 = vmax.f32 %v751_v8, 0.0  ;;  %1290 = vmatpush.bf16.msrb.mxu2 %v2944_v22 }
  0xc0   : > { %v822_v26 = vpack.c.bf16 %v785_v25, %v784_v24 }
  0xc1   : > { %v821_v17 = vpack.c.bf16 %v783_v13, %v782_v16  ;;  %v660_v27 = vpop.permute.xlu1 %659 }
  0xc2   : > { %931 = vmatmul.bf16.gmra.mxu2 %v820_v1  ;;  %v655_v28 = vpop.permute.xlu0 %654  ;;  %v720_v31 = vmul.f32 %v3302_v45, %v660_v27  ;;  %v791_v1 = vmax.f32 %v759_v62, 0.0 }
  0xc3   : > { %901 = vmatmul.bf16.gmra.mxu0 %v814_v3  ;;  %v719_v32 = vmul.f32 %v3302_v45, %v655_v28 }
  0xc4   : > { %v755_v34 = vadd.f32 %v3307_v46, %v720_v31 }
  0xc5   : > { %v754_v35 = vadd.f32 %v3307_v46, %v719_v32  ;;  %v2943_v32 = vld [vmem:[%s3784_s7 + $0x20] sm:$0xff] }
  0xc6   : > { %1291 = vmatpush.bf16.msrb.mxu2 %v2943_v32 }
  0xc7   : > { %v786_v37 = vmax.f32 %v754_v35, 0.0 }
  0xc9   : > { %v675_v55 = vpop.permute.xlu1 %674 }
  0xca   : > { %v670_v40 = vpop.permute.xlu0 %669  ;;  %v723_v58 = vmul.f32 %v3302_v45, %v675_v55 }
  0xcb   : > { %v722_v43 = vmul.f32 %v3302_v45, %v670_v40 }
  0xcc   : > { %v758_v61 = vadd.f32 %v3307_v46, %v723_v58 }
  0xcd   : > { %v757_v50 = vadd.f32 %v3307_v46, %v722_v43 }
  0xce   : > { %v790_v0 = vmax.f32 %v758_v61, 0.0 }
  0xcf   : > { %v789_v52 = vmax.f32 %v757_v50, 0.0  ;;  %v2942_v50 = vld [vmem:[%s3784_s7 + $0x18] sm:$0xff] }
  0xd0   : > { %v825_v3 = vpack.c.bf16 %v791_v1, %v790_v0  ;;  %1292 = vmatpush.bf16.msrb.mxu2 %v2942_v50 }
  0xd1   : > { %v824_v54 = vpack.c.bf16 %v789_v52, %v788_v53  ;;  %v690_v57 = vpop.permute.xlu1 %689 }
  0xd2   : > { %936 = vmatmul.bf16.gmra.mxu2 %v821_v17  ;;  %v685_v59 = vpop.permute.xlu0 %684  ;;  %v726_v5 = vmul.f32 %v3302_v45, %v690_v57 }
  0xd3   : > { %906 = vmatmul.bf16.gmra.mxu0 %v815_v18  ;;  %v725_v6 = vmul.f32 %v3302_v45, %v685_v59 }
  0xd4   : > { %v761_v8 = vadd.f32 %v3307_v46, %v726_v5 }
  0xd5   : > { %v760_v9 = vadd.f32 %v3307_v46, %v725_v6 }
  0xd6   : > { %v793_v16 = vmax.f32 %v761_v8, 0.0 }
  0xd7   : > { %v792_v17 = vmax.f32 %v760_v9, 0.0 }
  0xd9   : > { %v826_v18 = vpack.c.bf16 %v793_v16, %v792_v17  ;;  %v2940_v17 = vld [vmem:[%s3784_s7 + $0x8] sm:$0xff] }
  0xe2   : > { %941 = vmatmul.bf16.gmra.mxu2 %v822_v26 }
  0xe3   : > { %911 = vmatmul.bf16.gmra.mxu0 %v3325_v11  ;;  %v787_v11 = vmax.f32 %v755_v34, 0.0 }
  0xe5   : > { %v823_v39 = vpack.c.bf16 %v787_v11, %v786_v37 }
  0xf2   : > { %946 = vmatmul.bf16.gmra.mxu2 %v823_v39 }
  0xf3   : > { %916 = vmatmul.bf16.gmra.mxu0 %v3337_v29  ;;  %v2931_v29 = vld [vmem:[%s3782_s5] sm:$0xff] }
  0xf4   : > { %1090 = vmatpush.bf16.msra.mxu1 %v2931_v29  ;;  %2986 = vmatpush.bf16.msra.mxu3 %v2931_v29 }
 0x102   : > { %951 = vmatmul.bf16.gmra.mxu2 %v824_v54 }
 0x103   : > { %921 = vmatmul.bf16.gmra.mxu0 %v3345_v49  ;;  %v3414_v49 = vld [vmem:[%s3781_s4] ss:$0 sm:$0xff] }
 0x110   : > { %v887_v2 = vpop.f32.mrf.mxu0 }
 0x111   : > { %v888_v7 = vadd.f32 %v3414_v49, %v887_v2  ;;  %v2941_v2 = vld [vmem:[%s3784_s7 + $0x10] sm:$0xff] }
 0x112   : > { %956 = vmatmul.bf16.gmra.mxu2 %v825_v3 }
 0x113   : > { %v967_v13 = vmax.f32 %v888_v7, 0.0  ;;  %1293 = vmatpush.bf16.msrb.mxu2 %v2941_v2 }
 0x117   : > { %1294 = vmatpush.bf16.msrb.mxu2 %v2940_v17 }
 0x118   : > { %v889_v10 = vpop.f32.mrf.mxu0 }
 0x119   : > { %v890_v12 = vadd.f32 %v3414_v49, %v889_v10 }
 0x11b   : > { %v968_v14 = vmax.f32 %v890_v12, 0.0 }
 0x11d   : > { %v1016_v47 = vpack.c.bf16 %v968_v14, %v967_v13 }
 0x11f   : > { %1091 = vmatmul.bf16.vlgmr.msra.gmra.mxu1 %v1016_v47 }
 0x120   : > { %v892_v45 = vpop.f32.mrf.mxu0 }
 0x121   : > { %v893_v19 = vadd.f32 %v3414_v49, %v892_v45 }
 0x122   : > { %961 = vmatmul.bf16.gmra.mxu2 %v826_v18 }
 0x123   : > { %v969_v20 = vmax.f32 %v893_v19, 0.0 }
 0x128   : > { %v894_v46 = vpop.f32.mrf.mxu0 }
 0x129   : > { %v895_v4 = vadd.f32 %v3414_v49, %v894_v46 }
 0x12b   : > { %v970_v21 = vmax.f32 %v895_v4, 0.0 }
 0x12d   : > { %v1017_v23 = vpack.c.bf16 %v970_v21, %v969_v20 }
 0x12f   : > { %1096 = vmatmul.bf16.gmra.mxu1 %v1017_v23 }
 0x130   : > { %v897_v24 = vpop.f32.mrf.mxu0 }
 0x131   : > { %v898_v26 = vadd.f32 %v3414_v49, %v897_v24 }
 0x133   : > { %v971_v30 = vmax.f32 %v898_v26, 0.0 }
 0x135   : > { %v927_v25 = vpop.f32.mrf.mxu2 }
 0x136   : > { %v928_v33 = vadd.f32 %v3414_v49, %v927_v25  ;;  %v2939_v25 = vld [vmem:[%s3784_s7] sm:$0xff] }
 0x137   : > { %1295 = vmatpush.bf16.msrb.mxu2 %v2939_v25 }
 0x138   : > { %v899_v27 = vpop.f32.mrf.mxu0  ;;  %v983_v11 = vmax.f32 %v928_v33, 0.0 }
 0x139   : > { %v900_v28 = vadd.f32 %v3414_v49, %v899_v27 }
 0x13b   : > { %v972_v31 = vmax.f32 %v900_v28, 0.0 }
 0x13d   : > { %v929_v34 = vpop.f32.mrf.mxu2  ;;  %v1018_v35 = vpack.c.bf16 %v972_v31, %v971_v30 }
 0x13e   : > { %v930_v36 = vadd.f32 %v3414_v49, %v929_v34 }
 0x13f   : > { %1101 = vmatmul.bf16.gmra.mxu1 %v1018_v35 }
 0x140   : > { %v984_v37 = vmax.f32 %v930_v36, 0.0  ;;  %v902_v38 = vpop.f32.mrf.mxu0 }
 0x141   : > { %v903_v41 = vadd.f32 %v3414_v49, %v902_v38 }
 0x142   : > { %v1024_v39 = vpack.c.bf16 %v984_v37, %v983_v11 }
 0x143   : > { %v973_v44 = vmax.f32 %v903_v41, 0.0 }
 0x144   : > { %1131 = vmatmul.bf16.vlgmr.msra.gmra.mxu3 %v1024_v39 }
 0x145   : > { %v932_v40 = vpop.f32.mrf.mxu2 }
 0x146   : > { %v933_v51 = vadd.f32 %v3414_v49, %v932_v40 }
 0x148   : > { %v904_v42 = vpop.f32.mrf.mxu0  ;;  %v985_v54 = vmax.f32 %v933_v51, 0.0 }
 0x149   : > { %v905_v43 = vadd.f32 %v3414_v49, %v904_v42 }
 0x14b   : > { %v974_v48 = vmax.f32 %v905_v43, 0.0 }
 0x14d   : > { %v934_v29 = vpop.f32.mrf.mxu2  ;;  %v1019_v52 = vpack.c.bf16 %v974_v48, %v973_v44 }
 0x14e   : > { %v935_v53 = vadd.f32 %v3414_v49, %v934_v29 }
 0x14f   : > { %1106 = vmatmul.bf16.gmra.mxu1 %v1019_v52 }
 0x150   : > { %v986_v55 = vmax.f32 %v935_v53, 0.0  ;;  %v907_v56 = vpop.f32.mrf.mxu0 }
 0x151   : > { %v908_v61 = vadd.f32 %v3414_v49, %v907_v56 }
 0x152   : > { %v1025_v58 = vpack.c.bf16 %v986_v55, %v985_v54 }
 0x153   : > { %v975_v0 = vmax.f32 %v908_v61, 0.0  ;;  %v2954_v61 = vld [vmem:[%s3786_s9 + $0x38] sm:$0xff] }
 0x154   : > { %1136 = vmatmul.bf16.gmra.mxu3 %v1025_v58 }
 0x155   : > { %v937_v60 = vpop.f32.mrf.mxu2  ;;  %1493 = vmatpush.bf16.msrb.mxu3 %v2954_v61 }
 0x156   : > { %v938_v3 = vadd.f32 %v3414_v49, %v937_v60  ;;  %v3474_v60 = vld [vmem:[%s3783_s6] ss:$0 sm:$0xff] }
 0x158   : > { %v909_v62 = vpop.f32.mrf.mxu0  ;;  %v987_v6 = vmax.f32 %v938_v3, 0.0 }
 0x159   : > { %v910_v63 = vadd.f32 %v3414_v49, %v909_v62 }
 0x15b   : > { %v976_v1 = vmax.f32 %v910_v63, 0.0 }
 0x15d   : > { %v939_v57 = vpop.f32.mrf.mxu2  ;;  %v1020_v59 = vpack.c.bf16 %v976_v1, %v975_v0 }
 0x15e   : > { %v940_v5 = vadd.f32 %v3414_v49, %v939_v57 }
 0x15f   : > { %1111 = vmatmul.bf16.gmra.mxu1 %v1020_v59 }
 0x160   : > { %v988_v7 = vmax.f32 %v940_v5, 0.0  ;;  %v912_v8 = vpop.f32.mrf.mxu0 }
 0x161   : > { %v913_v12 = vadd.f32 %v3414_v49, %v912_v8 }
 0x162   : > { %v1026_v9 = vpack.c.bf16 %v988_v7, %v987_v6 }
 0x163   : > { %v977_v15 = vmax.f32 %v913_v12, 0.0  ;;  %v2953_v12 = vld [vmem:[%s3786_s9 + $0x30] sm:$0xff] }
 0x164   : > { %1141 = vmatmul.bf16.gmra.mxu3 %v1026_v9 }
 0x165   : > { %v942_v10 = vpop.f32.mrf.mxu2  ;;  %1494 = vmatpush.bf16.msrb.mxu3 %v2953_v12 }
 0x166   : > { %v943_v47 = vadd.f32 %v3414_v49, %v942_v10 }
 0x168   : > { %v914_v13 = vpop.f32.mrf.mxu0  ;;  %v989_v46 = vmax.f32 %v943_v47, 0.0 }
 0x169   : > { %v915_v14 = vadd.f32 %v3414_v49, %v914_v13 }
 0x16b   : > { %v978_v16 = vmax.f32 %v915_v14, 0.0 }
 0x16d   : > { %v944_v45 = vpop.f32.mrf.mxu2  ;;  %v1021_v18 = vpack.c.bf16 %v978_v16, %v977_v15 }
 0x16e   : > { %v945_v19 = vadd.f32 %v3414_v49, %v944_v45 }
 0x16f   : > { %1116 = vmatmul.bf16.gmra.mxu1 %v1021_v18 }
 0x170   : > { %v990_v4 = vmax.f32 %v945_v19, 0.0  ;;  %v917_v20 = vpop.f32.mrf.mxu0 }
 0x171   : > { %v918_v23 = vadd.f32 %v3414_v49, %v917_v20 }
 0x172   : > { %v1027_v21 = vpack.c.bf16 %v990_v4, %v989_v46 }
 0x173   : > { %v979_v27 = vmax.f32 %v918_v23, 0.0 }
 0x174   : > { %1146 = vmatmul.bf16.gmra.mxu3 %v1027_v21 }
 0x175   : > { %v947_v22 = vpop.f32.mrf.mxu2 }
 0x176   : > { %v948_v30 = vadd.f32 %v3414_v49, %v947_v22 }
 0x178   : > { %v919_v24 = vpop.f32.mrf.mxu0  ;;  %v991_v34 = vmax.f32 %v948_v30, 0.0 }
 0x179   : > { %v920_v26 = vadd.f32 %v3414_v49, %v919_v24 }
 0x17b   : > { %v980_v28 = vmax.f32 %v920_v26, 0.0  ;;  %v2951_v26 = vld [vmem:[%s3786_s9 + $0x20] sm:$0xff] }
 0x17d   : > { %v949_v31 = vpop.f32.mrf.mxu2  ;;  %v1022_v32 = vpack.c.bf16 %v980_v28, %v979_v27 }
 0x17e   : > { %v950_v33 = vadd.f32 %v3414_v49, %v949_v31 }
 0x17f   : > { %1121 = vmatmul.bf16.gmra.mxu1 %v1022_v32 }
 0x180   : > { %v992_v35 = vmax.f32 %v950_v33, 0.0  ;;  %v922_v36 = vpop.f32.mrf.mxu0 }
 0x181   : > { %v923_v38 = vadd.f32 %v3414_v49, %v922_v36 }
 0x182   : > { %v1028_v11 = vpack.c.bf16 %v992_v35, %v991_v34  ;;  %v2950_v35 = vld [vmem:[%s3786_s9 + $0x18] sm:$0xff] }
 0x183   : > { %v981_v41 = vmax.f32 %v923_v38, 0.0 }
 0x184   : > { %1151 = vmatmul.bf16.gmra.mxu3 %v1028_v11 }
 0x185   : > { %v952_v37 = vpop.f32.mrf.mxu2 }
 0x186   : > { %v953_v43 = vadd.f32 %v3414_v49, %v952_v37 }
 0x188   : > { %v924_v39 = vpop.f32.mrf.mxu0  ;;  %v993_v51 = vmax.f32 %v953_v43, 0.0 }
 0x189   : > { %v925_v40 = vadd.f32 %v3414_v49, %v924_v39 }
 0x18b   : > { %v982_v42 = vmax.f32 %v925_v40, 0.0 }
 0x18d   : > { %v954_v44 = vpop.f32.mrf.mxu2  ;;  %v1023_v48 = vpack.c.bf16 %v982_v42, %v981_v41  ;;  %v2949_v42 = vld [vmem:[%s3786_s9 + $0x10] sm:$0xff] }
 0x18e   : > { %v955_v50 = vadd.f32 %v3414_v49, %v954_v44 }
 0x18f   : > { %1126 = vmatmul.bf16.gmra.mxu1 %v1023_v48 }
 0x190   : > { %v994_v29 = vmax.f32 %v955_v50, 0.0 }
 0x192   : > { %v1029_v52 = vpack.c.bf16 %v994_v29, %v993_v51 }
 0x194   : > { %1156 = vmatmul.bf16.gmra.mxu3 %v1029_v52 }
 0x195   : > { %v957_v53 = vpop.f32.mrf.mxu2 }
 0x196   : > { %v958_v54 = vadd.f32 %v3414_v49, %v957_v53  ;;  %v2948_v53 = vld [vmem:[%s3786_s9 + $0x8] sm:$0xff] }
 0x198   : > { %v995_v62 = vmax.f32 %v958_v54, 0.0 }
 0x19c   : > { %v1092_v55 = vpop.f32.mrf.mxu1 }
 0x19d   : > { %v959_v56 = vpop.f32.mrf.mxu2  ;;  %v1093_v1 = vadd.f32 %v3474_v60, %v1092_v55 }
 0x19e   : > { %v960_v58 = vadd.f32 %v3414_v49, %v959_v56 }
 0x19f   : > { %v1172_v59 = vmax.f32 %v1093_v1, 0.0  ;;  %v2947_v1 = vld [vmem:[%s3786_s9] sm:$0xff] }
 0x1a0   : > { %v996_v63 = vmax.f32 %v960_v58, 0.0 }
 0x1a2   : > { %v1030_v0 = vpack.c.bf16 %v996_v63, %v995_v62 }
 0x1a4   : > { %v1094_v2 = vpop.f32.mrf.mxu1  ;;  %1161 = vmatmul.bf16.gmra.mxu3 %v1030_v0 }
 0x1a5   : > { %v1095_v3 = vadd.f32 %v3474_v60, %v1094_v2  ;;  %v962_v57 = vpop.f32.mrf.mxu2 }
 0x1a6   : > { %v963_v7 = vadd.f32 %v3414_v49, %v962_v57 }
 0x1a7   : > { %v1173_v5 = vmax.f32 %v1095_v3, 0.0 }
 0x1a8   : > { %v997_v13 = vmax.f32 %v963_v7, 0.0 }
 0x1a9   : > { %v1221_v6 = vpack.c.bf16 %v1173_v5, %v1172_v59 }
 0x1ab   : > { %1296 = vmatmul.bf16.vlgmr.msrb.gmra.mxu2 %v1221_v6 }
 0x1ac   : > { %v1097_v8 = vpop.f32.mrf.mxu1 }
 0x1ad   : > { %v964_v9 = vpop.f32.mrf.mxu2  ;;  %v1098_v16 = vadd.f32 %v3474_v60, %v1097_v8 }
 0x1ae   : > { %v965_v10 = vadd.f32 %v3414_v49, %v964_v9  ;;  %v2952_v49 = vld [vmem:[%s3786_s9 + $0x28] sm:$0xff] }
 0x1af   : > { %v1174_v45 = vmax.f32 %v1098_v16, 0.0  ;;  %1495 = vmatpush.bf16.msrb.mxu3 %v2952_v49 }
 0x1b0   : > { %v998_v14 = vmax.f32 %v965_v10, 0.0 }
 0x1b2   : > { %v1031_v15 = vpack.c.bf16 %v998_v14, %v997_v13 }
 0x1b3   : > { %1496 = vmatpush.bf16.msrb.mxu3 %v2951_v26 }
 0x1b4   : > { %v1099_v17 = vpop.f32.mrf.mxu1  ;;  %1166 = vmatmul.bf16.gmra.mxu3 %v1031_v15 }
 0x1b5   : > { %v1100_v47 = vadd.f32 %v3474_v60, %v1099_v17 }
 0x1b7   : > { %v1175_v18 = vmax.f32 %v1100_v47, 0.0  ;;  %1497 = vmatpush.bf16.msrb.mxu3 %v2950_v35 }
 0x1b9   : > { %v1222_v19 = vpack.c.bf16 %v1175_v18, %v1174_v45  ;;  %v3524_v18 = vld [vmem:[%s3785_s8] ss:$0 sm:$0xff] }
 0x1bb   : > { %1301 = vmatmul.bf16.gmra.mxu2 %v1222_v19  ;;  %1498 = vmatpush.bf16.msrb.mxu3 %v2949_v42  ;;  %v2962_v19 = vld [vmem:[%s3788_s11 + $0x38] sm:$0xff] }
 0x1bc   : > { %v1102_v46 = vpop.f32.mrf.mxu1  ;;  %1698 = vmatpush.bf16.msrb.mxu0 %v2962_v19 }
 0x1bd   : > { %v1103_v4 = vadd.f32 %v3474_v60, %v1102_v46 }
 0x1bf   : > { %v1176_v22 = vmax.f32 %v1103_v4, 0.0  ;;  %1499 = vmatpush.bf16.msrb.mxu3 %v2948_v53 }
 0x1c3   : > { %1500 = vmatpush.bf16.msrb.mxu3 %v2947_v1 }
 0x1c4   : > { %v1104_v20 = vpop.f32.mrf.mxu1 }
 0x1c5   : > { %v1105_v21 = vadd.f32 %v3474_v60, %v1104_v20 }
 0x1c7   : > { %v1177_v23 = vmax.f32 %v1105_v21, 0.0  ;;  %v1132_v29 = vpop.f32.mrf.mxu3 }
 0x1c8   : > { %v1133_v13 = vadd.f32 %v3474_v60, %v1132_v29 }
 0x1c9   : > { %v1223_v24 = vpack.c.bf16 %v1177_v23, %v1176_v22 }
 0x1ca   : > { %v1188_v15 = vmax.f32 %v1133_v13, 0.0 }
 0x1cb   : > { %1306 = vmatmul.bf16.gmra.mxu2 %v1223_v24 }
 0x1cc   : > { %v1107_v25 = vpop.f32.mrf.mxu1 }
 0x1cd   : > { %v1108_v27 = vadd.f32 %v3474_v60, %v1107_v25 }
 0x1cf   : > { %v1178_v31 = vmax.f32 %v1108_v27, 0.0  ;;  %v1134_v55 = vpop.f32.mrf.mxu3 }
 0x1d0   : > { %v1135_v12 = vadd.f32 %v3474_v60, %v1134_v55 }
 0x1d2   : > { %v1189_v14 = vmax.f32 %v1135_v12, 0.0 }
 0x1d4   : > { %v1109_v28 = vpop.f32.mrf.mxu1  ;;  %v1229_v16 = vpack.c.bf16 %v1189_v14, %v1188_v15 }
 0x1d5   : > { %v1110_v30 = vadd.f32 %v3474_v60, %v1109_v28 }
 0x1d7   : > { %v1179_v32 = vmax.f32 %v1110_v30, 0.0  ;;  %v1137_v2 = vpop.f32.mrf.mxu3 }
 0x1d8   : > { %v1138_v46 = vadd.f32 %v3474_v60, %v1137_v2  ;;  %v2959_v2 = vld [vmem:[%s3788_s11 + $0x20] sm:$0xff] }
 0x1d9   : > { %v1224_v33 = vpack.c.bf16 %v1179_v32, %v1178_v31  ;;  %v2961_v32 = vld [vmem:[%s3788_s11 + $0x30] sm:$0xff] }
 0x1da   : > { %v1190_v22 = vmax.f32 %v1138_v46, 0.0  ;;  %1699 = vmatpush.bf16.msrb.mxu0 %v2961_v32 }
 0x1db   : > { %1311 = vmatmul.bf16.gmra.mxu2 %v1224_v33 }
 0x1dc   : > { %v1112_v34 = vpop.f32.mrf.mxu1 }
 0x1dd   : > { %v1113_v36 = vadd.f32 %v3474_v60, %v1112_v34 }
 0x1df   : > { %v1180_v38 = vmax.f32 %v1113_v36, 0.0  ;;  %v1139_v6 = vpop.f32.mrf.mxu3 }
 0x1e0   : > { %v1140_v45 = vadd.f32 %v3474_v60, %v1139_v6 }
 0x1e2   : > { %v1191_v4 = vmax.f32 %v1140_v45, 0.0 }
 0x1e4   : > { %v1114_v11 = vpop.f32.mrf.mxu1  ;;  %v1230_v26 = vpack.c.bf16 %v1191_v4, %v1190_v22 }
 0x1e5   : > { %v1115_v37 = vadd.f32 %v3474_v60, %v1114_v11 }
 0x1e7   : > { %v1181_v39 = vmax.f32 %v1115_v37, 0.0  ;;  %v1142_v10 = vpop.f32.mrf.mxu3 }
 0x1e8   : > { %v1143_v33 = vadd.f32 %v3474_v60, %v1142_v10 }
 0x1e9   : > { %v1225_v40 = vpack.c.bf16 %v1181_v39, %v1180_v38 }
 0x1ea   : > { %v1192_v11 = vmax.f32 %v1143_v33, 0.0 }
 0x1eb   : > { %1316 = vmatmul.bf16.gmra.mxu2 %v1225_v40 }
 0x1ec   : > { %v1117_v41 = vpop.f32.mrf.mxu1 }
 0x1ed   : > { %v1118_v43 = vadd.f32 %v3474_v60, %v1117_v41 }
 0x1ef   : > { %v1182_v50 = vmax.f32 %v1118_v43, 0.0  ;;  %v1144_v17 = vpop.f32.mrf.mxu3 }
 0x1f0   : > { %v1145_v31 = vadd.f32 %v3474_v60, %v1144_v17  ;;  %v2958_v17 = vld [vmem:[%s3788_s11 + $0x18] sm:$0xff] }
 0x1f2   : > { %v1193_v34 = vmax.f32 %v1145_v31, 0.0 }
 0x1f4   : > { %v1119_v44 = vpop.f32.mrf.mxu1  ;;  %v1231_v41 = vpack.c.bf16 %v1193_v34, %v1192_v11 }
 0x1f5   : > { %v1120_v48 = vadd.f32 %v3474_v60, %v1119_v44 }
 0x1f7   : > { %v1183_v51 = vmax.f32 %v1120_v48, 0.0  ;;  %v1147_v49 = vpop.f32.mrf.mxu3  ;;  %v2960_v48 = vld [vmem:[%s3788_s11 + $0x28] sm:$0xff] }
 0x1f8   : > { %1700 = vmatpush.bf16.msrb.mxu0 %v2960_v48 }
 0x1f9   : > { %v1226_v52 = vpack.c.bf16 %v1183_v51, %v1182_v50  ;;  %v1148_v51 = vadd.f32 %v3474_v60, %v1147_v49 }
 0x1fb   : > { %1321 = vmatmul.bf16.gmra.mxu2 %v1226_v52 }
 0x1fc   : > { %v1122_v54 = vpop.f32.mrf.mxu1  ;;  %1701 = vmatpush.bf16.msrb.mxu0 %v2959_v2 }
 0x1fd   : > { %v1123_v56 = vadd.f32 %v3474_v60, %v1122_v54  ;;  %v1194_v54 = vmax.f32 %v1148_v51, 0.0 }
 0x1ff   : > { %v1184_v62 = vmax.f32 %v1123_v56, 0.0  ;;  %v1149_v28 = vpop.f32.mrf.mxu3 }
 0x200   : > { %v1150_v44 = vadd.f32 %v3474_v60, %v1149_v28  ;;  %1702 = vmatpush.bf16.msrb.mxu0 %v2958_v17 }
 0x202   : > { %v1195_v29 = vmax.f32 %v1150_v44, 0.0 }
 0x204   : > { %v1124_v58 = vpop.f32.mrf.mxu1 }
 0x205   : > { %v1125_v61 = vadd.f32 %v3474_v60, %v1124_v58 }
 0x207   : > { %v1185_v63 = vmax.f32 %v1125_v61, 0.0  ;;  %v1152_v38 = vpop.f32.mrf.mxu3  ;;  %v1232_v61 = vpack.c.bf16 %v1195_v29, %v1194_v54 }
 0x209   : > { %v1227_v0 = vpack.c.bf16 %v1185_v63, %v1184_v62 }
 0x20b   : > { %1326 = vmatmul.bf16.gmra.mxu2 %v1227_v0 }
 0x20c   : > { %v1127_v3 = vpop.f32.mrf.mxu1 }
 0x20d   : > { %v1128_v57 = vadd.f32 %v3474_v60, %v1127_v3  ;;  %v1153_v3 = vadd.f32 %v3474_v60, %v1152_v38 }
 0x20f   : > { %v1186_v7 = vmax.f32 %v1128_v57, 0.0  ;;  %v1154_v50 = vpop.f32.mrf.mxu3 }
 0x210   : > { %v1155_v1 = vadd.f32 %v3474_v60, %v1154_v50 }
 0x212   : > { %v1197_v57 = vmax.f32 %v1155_v1, 0.0 }
 0x214   : > { %v1129_v59 = vpop.f32.mrf.mxu1 }
 0x215   : > { %v1130_v5 = vadd.f32 %v3474_v60, %v1129_v59 }
 0x217   : > { %v1187_v8 = vmax.f32 %v1130_v5, 0.0  ;;  %v1157_v63 = vpop.f32.mrf.mxu3 }
 0x219   : > { %v1228_v9 = vpack.c.bf16 %v1187_v8, %v1186_v7  ;;  %v1196_v7 = vmax.f32 %v1153_v3, 0.0 }
 0x21b   : > { %1331 = vmatmul.bf16.gmra.mxu2 %v1228_v9  ;;  %v1233_v12 = vpack.c.bf16 %v1197_v57, %v1196_v7 }
 0x21f   : > { %v1159_v5 = vpop.f32.mrf.mxu3 }
 0x227   : > { %v1162_v15 = vpop.f32.mrf.mxu3 }
 0x228   : > { %v1163_v28 = vadd.f32 %v3474_v60, %v1162_v15 }
 0x22a   : > { %v1200_v34 = vmax.f32 %v1163_v28, 0.0 }
 0x22b   : > { %1336 = vmatmul.bf16.gmra.mxu2 %v1229_v16  ;;  %v1160_v16 = vadd.f32 %v3474_v60, %v1159_v5 }
 0x22d   : > { %v1199_v45 = vmax.f32 %v1160_v16, 0.0 }
 0x22e   : > { %v1297_v47 = vpop.f32.mrf.mxu2 }
 0x22f   : > { %v1298_v20 = vadd.f32 %v3524_v18, %v1297_v47  ;;  %v1158_v47 = vadd.f32 %v3474_v60, %v1157_v63 }
 0x231   : > { %v1377_v24 = vmax.f32 %v1298_v20, 0.0  ;;  %v1198_v49 = vmax.f32 %v1158_v47, 0.0 }
 0x233   : > { %v1234_v22 = vpack.c.bf16 %v1199_v45, %v1198_v49 }
 0x236   : > { %v1299_v21 = vpop.f32.mrf.mxu2 }
 0x237   : > { %v1300_v23 = vadd.f32 %v3524_v18, %v1299_v21 }
 0x239   : > { %v1378_v25 = vmax.f32 %v1300_v23, 0.0  ;;  %v1164_v23 = vpop.f32.mrf.mxu3 }
 0x23b   : > { %1341 = vmatmul.bf16.gmra.mxu2 %v1230_v26  ;;  %v1426_v27 = vpack.c.bf16 %v1378_v25, %v1377_v24  ;;  %v1165_v26 = vadd.f32 %v3474_v60, %v1164_v23 }
 0x23d   : > { %1501 = vmatmul.bf16.vlgmr.msrb.gmra.mxu3 %v1426_v27  ;;  %v2957_v27 = vld [vmem:[%s3788_s11 + $0x10] sm:$0xff]  ;;  %v1201_v31 = vmax.f32 %v1165_v26, 0.0 }
 0x23e   : > { %v1302_v30 = vpop.f32.mrf.mxu2  ;;  %1703 = vmatpush.bf16.msrb.mxu0 %v2957_v27 }
 0x23f   : > { %v1303_v35 = vadd.f32 %v3524_v18, %v1302_v30 }
 0x241   : > { %v1379_v39 = vmax.f32 %v1303_v35, 0.0  ;;  %v1167_v30 = vpop.f32.mrf.mxu3 }
 0x246   : > { %v1304_v36 = vpop.f32.mrf.mxu2 }
 0x247   : > { %v1305_v37 = vadd.f32 %v3524_v18, %v1304_v36 }
 0x249   : > { %v1380_v40 = vmax.f32 %v1305_v37, 0.0  ;;  %v1235_v37 = vpack.c.bf16 %v1201_v31, %v1200_v34 }
 0x24b   : > { %1346 = vmatmul.bf16.gmra.mxu2 %v1231_v41  ;;  %v1427_v42 = vpack.c.bf16 %v1380_v40, %v1379_v39  ;;  %v1169_v39 = vpop.f32.mrf.mxu3 }
 0x24c   : > { %v1170_v41 = vadd.f32 %v3474_v60, %v1169_v39 }
 0x24d   : > { %1506 = vmatmul.bf16.gmra.mxu3 %v1427_v42  ;;  %v2956_v42 = vld [vmem:[%s3788_s11 + $0x8] sm:$0xff] }
 0x24e   : > { %v1307_v43 = vpop.f32.mrf.mxu2  ;;  %1704 = vmatpush.bf16.msrb.mxu0 %v2956_v42  ;;  %v1203_v44 = vmax.f32 %v1170_v41, 0.0 }
 0x24f   : > { %v1308_v52 = vadd.f32 %v3524_v18, %v1307_v43  ;;  %v1168_v43 = vadd.f32 %v3474_v60, %v1167_v30 }
 0x251   : > { %v1381_v56 = vmax.f32 %v1308_v52, 0.0  ;;  %v1202_v51 = vmax.f32 %v1168_v43, 0.0 }
 0x253   : > { %v1236_v54 = vpack.c.bf16 %v1203_v44, %v1202_v51 }
 0x256   : > { %v1309_v53 = vpop.f32.mrf.mxu2 }
 0x257   : > { %v1310_v55 = vadd.f32 %v3524_v18, %v1309_v53 }
 0x259   : > { %v1382_v58 = vmax.f32 %v1310_v55, 0.0 }
 0x25b   : > { %1351 = vmatmul.bf16.gmra.mxu2 %v1232_v61  ;;  %v1428_v62 = vpack.c.bf16 %v1382_v58, %v1381_v56  ;;  %v2955_v58 = vld [vmem:[%s3788_s11] sm:$0xff] }
 0x25c   : > { %1705 = vmatpush.bf16.msrb.mxu0 %v2955_v58 }
 0x25d   : > { %1511 = vmatmul.bf16.gmra.mxu3 %v1428_v62 }
 0x25e   : > { %v1312_v0 = vpop.f32.mrf.mxu2 }
 0x25f   : > { %v1313_v59 = vadd.f32 %v3524_v18, %v1312_v0 }
 0x261   : > { %v1383_v9 = vmax.f32 %v1313_v59, 0.0 }
 0x266   : > { %v1314_v6 = vpop.f32.mrf.mxu2 }
 0x267   : > { %v1315_v8 = vadd.f32 %v3524_v18, %v1314_v6 }
 0x269   : > { %v1384_v10 = vmax.f32 %v1315_v8, 0.0  ;;  %v2970_v8 = vld [vmem:[%s3790_s13 + $0x38] sm:$0xff] }
 0x26a   : > { %1903 = vmatpush.bf16.msrb.mxu1 %v2970_v8 }
 0x26b   : > { %1356 = vmatmul.bf16.gmra.mxu2 %v1233_v12  ;;  %v1429_v13 = vpack.c.bf16 %v1384_v10, %v1383_v9  ;;  %v3587_v12 = vld [vmem:[%s3787_s10] ss:$0 sm:$0xff] }
 0x26d   : > { %1516 = vmatmul.bf16.gmra.mxu3 %v1429_v13 }
 0x26e   : > { %v1317_v14 = vpop.f32.mrf.mxu2 }
 0x26f   : > { %v1318_v19 = vadd.f32 %v3524_v18, %v1317_v14 }
 0x271   : > { %v1385_v20 = vmax.f32 %v1318_v19, 0.0 }
 0x276   : > { %v1319_v46 = vpop.f32.mrf.mxu2 }
 0x277   : > { %v1320_v4 = vadd.f32 %v3524_v18, %v1319_v46 }
 0x279   : > { %v1386_v21 = vmax.f32 %v1320_v4, 0.0 }
 0x27b   : > { %v1430_v24 = vpack.c.bf16 %v1386_v21, %v1385_v20  ;;  %1361 = vmatmul.bf16.gmra.mxu2 %v1234_v22  ;;  %v2969_v20 = vld [vmem:[%s3790_s13 + $0x30] sm:$0xff] }
 0x27c   : > { %1904 = vmatpush.bf16.msrb.mxu1 %v2969_v20 }
 0x27d   : > { %1521 = vmatmul.bf16.gmra.mxu3 %v1430_v24 }
 0x27e   : > { %v1322_v25 = vpop.f32.mrf.mxu2 }
 0x27f   : > { %v1323_v32 = vadd.f32 %v3524_v18, %v1322_v25 }
 0x281   : > { %v1387_v36 = vmax.f32 %v1323_v32, 0.0 }
 0x286   : > { %v1324_v33 = vpop.f32.mrf.mxu2 }
 0x287   : > { %v1325_v35 = vadd.f32 %v3524_v18, %v1324_v33 }
 0x289   : > { %v1388_v11 = vmax.f32 %v1325_v35, 0.0 }
 0x28b   : > { %v1431_v38 = vpack.c.bf16 %v1388_v11, %v1387_v36  ;;  %1366 = vmatmul.bf16.gmra.mxu2 %v1235_v37  ;;  %v2968_v36 = vld [vmem:[%s3790_s13 + $0x28] sm:$0xff] }
 0x28c   : > { %1905 = vmatpush.bf16.msrb.mxu1 %v2968_v36 }
 0x28d   : > { %1526 = vmatmul.bf16.gmra.mxu3 %v1431_v38 }
 0x28e   : > { %v1327_v40 = vpop.f32.mrf.mxu2 }
 0x28f   : > { %v1328_v48 = vadd.f32 %v3524_v18, %v1327_v40 }
 0x291   : > { %v1389_v52 = vmax.f32 %v1328_v48, 0.0 }
 0x296   : > { %v1329_v50 = vpop.f32.mrf.mxu2 }
 0x297   : > { %v1330_v29 = vadd.f32 %v3524_v18, %v1329_v50 }
 0x299   : > { %v1390_v53 = vmax.f32 %v1330_v29, 0.0 }
 0x29b   : > { %v1432_v55 = vpack.c.bf16 %v1390_v53, %v1389_v52  ;;  %1371 = vmatmul.bf16.gmra.mxu2 %v1236_v54  ;;  %v2967_v54 = vld [vmem:[%s3790_s13 + $0x20] sm:$0xff] }
 0x29c   : > { %1906 = vmatpush.bf16.msrb.mxu1 %v2967_v54 }
 0x29d   : > { %1531 = vmatmul.bf16.gmra.mxu3 %v1432_v55 }
 0x29e   : > { %v1332_v56 = vpop.f32.mrf.mxu2 }
 0x29f   : > { %v1333_v60 = vadd.f32 %v3524_v18, %v1332_v56 }
 0x2a1   : > { %v1391_v63 = vmax.f32 %v1333_v60, 0.0 }
 0x2a6   : > { %v1334_v61 = vpop.f32.mrf.mxu2 }
 0x2a7   : > { %v1335_v62 = vadd.f32 %v3524_v18, %v1334_v61 }
 0x2a9   : > { %v1392_v0 = vmax.f32 %v1335_v62, 0.0 }
 0x2ab   : > { %v1433_v1 = vpack.c.bf16 %v1392_v0, %v1391_v63 }
 0x2ad   : > { %1536 = vmatmul.bf16.gmra.mxu3 %v1433_v1 }
 0x2ae   : > { %v1337_v2 = vpop.f32.mrf.mxu2 }
 0x2af   : > { %v1338_v3 = vadd.f32 %v3524_v18, %v1337_v2 }
 0x2b1   : > { %v1393_v5 = vmax.f32 %v1338_v3, 0.0 }
 0x2b6   : > { %v1339_v57 = vpop.f32.mrf.mxu2 }
 0x2b7   : > { %v1340_v59 = vadd.f32 %v3524_v18, %v1339_v57 }
 0x2b9   : > { %v1394_v6 = vmax.f32 %v1340_v59, 0.0 }
 0x2bb   : > { %v1434_v7 = vpack.c.bf16 %v1394_v6, %v1393_v5  ;;  %v2966_v6 = vld [vmem:[%s3790_s13 + $0x18] sm:$0xff] }
 0x2bc   : > { %1907 = vmatpush.bf16.msrb.mxu1 %v2966_v6 }
 0x2bd   : > { %1541 = vmatmul.bf16.gmra.mxu3 %v1434_v7 }
 0x2be   : > { %v1342_v9 = vpop.f32.mrf.mxu2 }
 0x2bf   : > { %v1343_v13 = vadd.f32 %v3524_v18, %v1342_v9 }
 0x2c0   : > { %v1502_v10 = vpop.f32.mrf.mxu3 }
 0x2c1   : > { %v1503_v15 = vadd.f32 %v3587_v12, %v1502_v10  ;;  %v1395_v47 = vmax.f32 %v1343_v13, 0.0 }
 0x2c3   : > { %v1582_v46 = vmax.f32 %v1503_v15, 0.0 }
 0x2c6   : > { %v1344_v14 = vpop.f32.mrf.mxu2 }
 0x2c7   : > { %v1345_v16 = vadd.f32 %v3524_v18, %v1344_v14 }
 0x2c8   : > { %v1504_v17 = vpop.f32.mrf.mxu3 }
 0x2c9   : > { %v1396_v45 = vmax.f32 %v1345_v16, 0.0  ;;  %v1505_v19 = vadd.f32 %v3587_v12, %v1504_v17 }
 0x2cb   : > { %v1435_v49 = vpack.c.bf16 %v1396_v45, %v1395_v47  ;;  %v1583_v4 = vmax.f32 %v1505_v19, 0.0 }
 0x2cd   : > { %1546 = vmatmul.bf16.gmra.mxu3 %v1435_v49  ;;  %v1631_v21 = vpack.c.bf16 %v1583_v4, %v1582_v46  ;;  %v2965_v4 = vld [vmem:[%s3790_s13 + $0x10] sm:$0xff] }
 0x2ce   : > { %v1347_v22 = vpop.f32.mrf.mxu2  ;;  %1908 = vmatpush.bf16.msrb.mxu1 %v2965_v4 }
 0x2cf   : > { %1706 = vmatmul.bf16.vlgmr.msrb.gmra.mxu0 %v1631_v21  ;;  %v1348_v24 = vadd.f32 %v3524_v18, %v1347_v22 }
 0x2d0   : > { %v1507_v23 = vpop.f32.mrf.mxu3 }
 0x2d1   : > { %v1508_v26 = vadd.f32 %v3587_v12, %v1507_v23  ;;  %v1397_v30 = vmax.f32 %v1348_v24, 0.0 }
 0x2d3   : > { %v1584_v33 = vmax.f32 %v1508_v26, 0.0 }
 0x2d6   : > { %v1349_v25 = vpop.f32.mrf.mxu2 }
 0x2d7   : > { %v1350_v27 = vadd.f32 %v3524_v18, %v1349_v25 }
 0x2d8   : > { %v1509_v28 = vpop.f32.mrf.mxu3 }
 0x2d9   : > { %v1398_v31 = vmax.f32 %v1350_v27, 0.0  ;;  %v1510_v32 = vadd.f32 %v3587_v12, %v1509_v28 }
 0x2db   : > { %v1436_v34 = vpack.c.bf16 %v1398_v31, %v1397_v30  ;;  %v1585_v35 = vmax.f32 %v1510_v32, 0.0 }
 0x2dd   : > { %1551 = vmatmul.bf16.gmra.mxu3 %v1436_v34  ;;  %v1632_v11 = vpack.c.bf16 %v1585_v35, %v1584_v33  ;;  %v2964_v35 = vld [vmem:[%s3790_s13 + $0x8] sm:$0xff] }
 0x2de   : > { %v1352_v37 = vpop.f32.mrf.mxu2  ;;  %1909 = vmatpush.bf16.msrb.mxu1 %v2964_v35 }
 0x2df   : > { %1711 = vmatmul.bf16.gmra.mxu0 %v1632_v11  ;;  %v1353_v39 = vadd.f32 %v3524_v18, %v1352_v37 }
 0x2e0   : > { %v1512_v38 = vpop.f32.mrf.mxu3 }
 0x2e1   : > { %v1513_v41 = vadd.f32 %v3587_v12, %v1512_v38  ;;  %v1399_v44 = vmax.f32 %v1353_v39, 0.0 }
 0x2e3   : > { %v1586_v51 = vmax.f32 %v1513_v41, 0.0 }
 0x2e6   : > { %v1354_v40 = vpop.f32.mrf.mxu2 }
 0x2e7   : > { %v1355_v42 = vadd.f32 %v3524_v18, %v1354_v40 }
 0x2e8   : > { %v1514_v43 = vpop.f32.mrf.mxu3 }
 0x2e9   : > { %v1400_v48 = vmax.f32 %v1355_v42, 0.0  ;;  %v1515_v50 = vadd.f32 %v3587_v12, %v1514_v43 }
 0x2eb   : > { %v1437_v29 = vpack.c.bf16 %v1400_v48, %v1399_v44  ;;  %v1587_v52 = vmax.f32 %v1515_v50, 0.0 }
 0x2ed   : > { %1556 = vmatmul.bf16.gmra.mxu3 %v1437_v29  ;;  %v1633_v53 = vpack.c.bf16 %v1587_v52, %v1586_v51  ;;  %v2963_v52 = vld [vmem:[%s3790_s13] sm:$0xff] }
 0x2ee   : > { %v1357_v55 = vpop.f32.mrf.mxu2  ;;  %1910 = vmatpush.bf16.msrb.mxu1 %v2963_v52 }
 0x2ef   : > { %1716 = vmatmul.bf16.gmra.mxu0 %v1633_v53  ;;  %v1358_v58 = vadd.f32 %v3524_v18, %v1357_v55 }
 0x2f0   : > { %v1517_v56 = vpop.f32.mrf.mxu3 }
 0x2f1   : > { %v1518_v61 = vadd.f32 %v3587_v12, %v1517_v56  ;;  %v1401_v0 = vmax.f32 %v1358_v58, 0.0 }
 0x2f3   : > { %v1588_v3 = vmax.f32 %v1518_v61, 0.0 }
 0x2f6   : > { %v1359_v60 = vpop.f32.mrf.mxu2 }
 0x2f7   : > { %v1360_v62 = vadd.f32 %v3524_v18, %v1359_v60 }
 0x2f8   : > { %v1519_v63 = vpop.f32.mrf.mxu3 }
 0x2f9   : > { %v1402_v1 = vmax.f32 %v1360_v62, 0.0  ;;  %v1520_v2 = vadd.f32 %v3587_v12, %v1519_v63 }
 0x2fb   : > { %v1438_v57 = vpack.c.bf16 %v1402_v1, %v1401_v0  ;;  %v1589_v59 = vmax.f32 %v1520_v2, 0.0 }
 0x2fd   : > { %1561 = vmatmul.bf16.gmra.mxu3 %v1438_v57  ;;  %v1634_v5 = vpack.c.bf16 %v1589_v59, %v1588_v3  ;;  %v3645_v59 = vld [vmem:[%s3789_s12] ss:$0 sm:$0xff] }
 0x2fe   : > { %v1362_v7 = vpop.f32.mrf.mxu2 }
 0x2ff   : > { %1721 = vmatmul.bf16.gmra.mxu0 %v1634_v5  ;;  %v1363_v9 = vadd.f32 %v3524_v18, %v1362_v7 }
 0x300   : > { %v1522_v8 = vpop.f32.mrf.mxu3 }
 0x301   : > { %v1523_v13 = vadd.f32 %v3587_v12, %v1522_v8  ;;  %v1403_v16 = vmax.f32 %v1363_v9, 0.0 }
 0x303   : > { %v1590_v45 = vmax.f32 %v1523_v13, 0.0 }
 0x306   : > { %v1364_v10 = vpop.f32.mrf.mxu2 }
 0x307   : > { %v1365_v14 = vadd.f32 %v3524_v18, %v1364_v10 }
 0x308   : > { %v1524_v15 = vpop.f32.mrf.mxu3 }
 0x309   : > { %v1404_v17 = vmax.f32 %v1365_v14, 0.0  ;;  %v1525_v47 = vadd.f32 %v3587_v12, %v1524_v15 }
 0x30b   : > { %v1439_v19 = vpack.c.bf16 %v1404_v17, %v1403_v16  ;;  %v1591_v46 = vmax.f32 %v1525_v47, 0.0 }
 0x30d   : > { %v1635_v49 = vpack.c.bf16 %v1591_v46, %v1590_v45  ;;  %1566 = vmatmul.bf16.gmra.mxu3 %v1439_v19 }
 0x30e   : > { %v1367_v20 = vpop.f32.mrf.mxu2 }
 0x30f   : > { %1726 = vmatmul.bf16.gmra.mxu0 %v1635_v49  ;;  %v1368_v22 = vadd.f32 %v3524_v18, %v1367_v20 }
 0x310   : > { %v1527_v21 = vpop.f32.mrf.mxu3 }
 0x311   : > { %v1528_v24 = vadd.f32 %v3587_v12, %v1527_v21  ;;  %v1405_v27 = vmax.f32 %v1368_v22, 0.0 }
 0x313   : > { %v1592_v31 = vmax.f32 %v1528_v24, 0.0 }
 0x316   : > { %v1369_v23 = vpop.f32.mrf.mxu2 }
 0x317   : > { %v1370_v25 = vadd.f32 %v3524_v18, %v1369_v23 }
 0x318   : > { %v1529_v26 = vpop.f32.mrf.mxu3 }
 0x319   : > { %v1406_v28 = vmax.f32 %v1370_v25, 0.0  ;;  %v1530_v30 = vadd.f32 %v3587_v12, %v1529_v26 }
 0x31b   : > { %v1440_v32 = vpack.c.bf16 %v1406_v28, %v1405_v27  ;;  %v1593_v33 = vmax.f32 %v1530_v30, 0.0 }
 0x31d   : > { %v1636_v34 = vpack.c.bf16 %v1593_v33, %v1592_v31  ;;  %1571 = vmatmul.bf16.gmra.mxu3 %v1440_v32 }
 0x31e   : > { %v1372_v36 = vpop.f32.mrf.mxu2 }
 0x31f   : > { %1731 = vmatmul.bf16.gmra.mxu0 %v1636_v34  ;;  %v1373_v37 = vadd.f32 %v3524_v18, %v1372_v36 }
 0x320   : > { %v1532_v11 = vpop.f32.mrf.mxu3 }
 0x321   : > { %v1533_v39 = vadd.f32 %v3587_v12, %v1532_v11  ;;  %v1407_v42 = vmax.f32 %v1373_v37, 0.0 }
 0x323   : > { %v1594_v48 = vmax.f32 %v1533_v39, 0.0 }
 0x326   : > { %v1374_v38 = vpop.f32.mrf.mxu2 }
 0x327   : > { %v1375_v40 = vadd.f32 %v3524_v18, %v1374_v38 }
 0x328   : > { %v1534_v41 = vpop.f32.mrf.mxu3 }
 0x329   : > { %v1408_v43 = vmax.f32 %v1375_v40, 0.0  ;;  %v1535_v44 = vadd.f32 %v3587_v12, %v1534_v41 }
 0x32b   : > { %v1441_v50 = vpack.c.bf16 %v1408_v43, %v1407_v42  ;;  %v1595_v51 = vmax.f32 %v1535_v44, 0.0 }
 0x32d   : > { %v1637_v29 = vpack.c.bf16 %v1595_v51, %v1594_v48  ;;  %1576 = vmatmul.bf16.gmra.mxu3 %v1441_v50 }
 0x32f   : > { %1736 = vmatmul.bf16.gmra.mxu0 %v1637_v29 }
 0x330   : > { %v1537_v53 = vpop.f32.mrf.mxu3 }
 0x331   : > { %v1538_v54 = vadd.f32 %v3587_v12, %v1537_v53 }
 0x333   : > { %v1596_v56 = vmax.f32 %v1538_v54, 0.0 }
 0x338   : > { %v1539_v18 = vpop.f32.mrf.mxu3 }
 0x339   : > { %v1540_v55 = vadd.f32 %v3587_v12, %v1539_v18 }
 0x33b   : > { %v1597_v58 = vmax.f32 %v1540_v55, 0.0 }
 0x33d   : > { %v1638_v60 = vpack.c.bf16 %v1597_v58, %v1596_v56 }
 0x33f   : > { %1741 = vmatmul.bf16.gmra.mxu0 %v1638_v60 }
 0x340   : > { %v1542_v61 = vpop.f32.mrf.mxu3 }
 0x341   : > { %v1543_v62 = vadd.f32 %v3587_v12, %v1542_v61 }
 0x343   : > { %v1598_v1 = vmax.f32 %v1543_v62, 0.0 }
 0x348   : > { %v1544_v63 = vpop.f32.mrf.mxu3 }
 0x349   : > { %v1545_v0 = vadd.f32 %v3587_v12, %v1544_v63 }
 0x34b   : > { %v1599_v2 = vmax.f32 %v1545_v0, 0.0 }
 0x34c   : > { %v1707_v3 = vpop.f32.mrf.mxu0 }
 0x34d   : > { %v1639_v57 = vpack.c.bf16 %v1599_v2, %v1598_v1  ;;  %v1708_v6 = vadd.f32 %v3645_v59, %v1707_v3 }
 0x34f   : > { %1746 = vmatmul.bf16.gmra.mxu0 %v1639_v57  ;;  %v1787_v9 = vmax.f32 %v1708_v6, 0.0 }
 0x350   : > { %v1547_v5 = vpop.f32.mrf.mxu3 }
 0x351   : > { %v1548_v10 = vadd.f32 %v3587_v12, %v1547_v5 }
 0x353   : > { %v1600_v17 = vmax.f32 %v1548_v10, 0.0 }
 0x354   : > { %v1709_v7 = vpop.f32.mrf.mxu0 }
 0x355   : > { %v1710_v8 = vadd.f32 %v3645_v59, %v1709_v7 }
 0x357   : > { %v1788_v13 = vmax.f32 %v1710_v8, 0.0 }
 0x358   : > { %v1549_v14 = vpop.f32.mrf.mxu3 }
 0x359   : > { %v1550_v15 = vadd.f32 %v3587_v12, %v1549_v14  ;;  %v1836_v16 = vpack.c.bf16 %v1788_v13, %v1787_v9 }
 0x35b   : > { %v1601_v47 = vmax.f32 %v1550_v15, 0.0  ;;  %1911 = vmatmul.bf16.vlgmr.msrb.gmra.mxu1 %v1836_v16 }
 0x35c   : > { %v1712_v45 = vpop.f32.mrf.mxu0 }
 0x35d   : > { %v1640_v19 = vpack.c.bf16 %v1601_v47, %v1600_v17  ;;  %v1713_v49 = vadd.f32 %v3645_v59, %v1712_v45 }
 0x35f   : > { %1751 = vmatmul.bf16.gmra.mxu0 %v1640_v19  ;;  %v1789_v21 = vmax.f32 %v1713_v49, 0.0 }
 0x360   : > { %v1552_v46 = vpop.f32.mrf.mxu3 }
 0x361   : > { %v1553_v22 = vadd.f32 %v3587_v12, %v1552_v46 }
 0x363   : > { %v1602_v27 = vmax.f32 %v1553_v22, 0.0 }
 0x364   : > { %v1714_v4 = vpop.f32.mrf.mxu0 }
 0x365   : > { %v1715_v20 = vadd.f32 %v3645_v59, %v1714_v4 }
 0x367   : > { %v1790_v23 = vmax.f32 %v1715_v20, 0.0 }
 0x368   : > { %v1554_v24 = vpop.f32.mrf.mxu3 }
 0x369   : > { %v1555_v25 = vadd.f32 %v3587_v12, %v1554_v24  ;;  %v1837_v26 = vpack.c.bf16 %v1790_v23, %v1789_v21 }
 0x36b   : > { %v1603_v28 = vmax.f32 %v1555_v25, 0.0  ;;  %1916 = vmatmul.bf16.gmra.mxu1 %v1837_v26 }
 0x36c   : > { %v1717_v30 = vpop.f32.mrf.mxu0 }
 0x36d   : > { %v1641_v31 = vpack.c.bf16 %v1603_v28, %v1602_v27  ;;  %v1718_v33 = vadd.f32 %v3645_v59, %v1717_v30 }
 0x36f   : > { %1756 = vmatmul.bf16.gmra.mxu0 %v1641_v31  ;;  %v1791_v36 = vmax.f32 %v1718_v33, 0.0 }
 0x370   : > { %v1557_v32 = vpop.f32.mrf.mxu3 }
 0x371   : > { %v1558_v11 = vadd.f32 %v3587_v12, %v1557_v32 }
 0x373   : > { %v1604_v41 = vmax.f32 %v1558_v11, 0.0 }
 0x374   : > { %v1719_v34 = vpop.f32.mrf.mxu0 }
 0x375   : > { %v1720_v35 = vadd.f32 %v3645_v59, %v1719_v34 }
 0x377   : > { %v1792_v37 = vmax.f32 %v1720_v35, 0.0 }
 0x378   : > { %v1559_v38 = vpop.f32.mrf.mxu3 }
 0x379   : > { %v1560_v39 = vadd.f32 %v3587_v12, %v1559_v38  ;;  %v1838_v40 = vpack.c.bf16 %v1792_v37, %v1791_v36 }
 0x37b   : > { %v1605_v42 = vmax.f32 %v1560_v39, 0.0  ;;  %1921 = vmatmul.bf16.gmra.mxu1 %v1838_v40 }
 0x37c   : > { %v1722_v43 = vpop.f32.mrf.mxu0 }
 0x37d   : > { %v1642_v44 = vpack.c.bf16 %v1605_v42, %v1604_v41  ;;  %v1723_v50 = vadd.f32 %v3645_v59, %v1722_v43 }
 0x37f   : > { %1761 = vmatmul.bf16.gmra.mxu0 %v1642_v44  ;;  %v1793_v52 = vmax.f32 %v1723_v50, 0.0 }
 0x380   : > { %v1562_v48 = vpop.f32.mrf.mxu3 }
 0x381   : > { %v1563_v53 = vadd.f32 %v3587_v12, %v1562_v48 }
 0x383   : > { %v1606_v58 = vmax.f32 %v1563_v53, 0.0 }
 0x384   : > { %v1724_v51 = vpop.f32.mrf.mxu0 }
 0x385   : > { %v1725_v29 = vadd.f32 %v3645_v59, %v1724_v51 }
 0x387   : > { %v1794_v54 = vmax.f32 %v1725_v29, 0.0  ;;  %v3682_v29 = vld [vmem:[%s3791_s14] ss:$0 sm:$0xff] }
 0x388   : > { %v1564_v18 = vpop.f32.mrf.mxu3 }
 0x389   : > { %v1565_v55 = vadd.f32 %v3587_v12, %v1564_v18  ;;  %v1839_v56 = vpack.c.bf16 %v1794_v54, %v1793_v52 }
 0x38b   : > { %v1607_v60 = vmax.f32 %v1565_v55, 0.0  ;;  %1926 = vmatmul.bf16.gmra.mxu1 %v1839_v56 }
 0x38c   : > { %v1727_v61 = vpop.f32.mrf.mxu0 }
 0x38d   : > { %v1643_v62 = vpack.c.bf16 %v1607_v60, %v1606_v58  ;;  %v1728_v0 = vadd.f32 %v3645_v59, %v1727_v61 }
 0x38f   : > { %1766 = vmatmul.bf16.gmra.mxu0 %v1643_v62  ;;  %v1795_v3 = vmax.f32 %v1728_v0, 0.0 }
 0x390   : > { %v1567_v63 = vpop.f32.mrf.mxu3 }
 0x391   : > { %v1568_v57 = vadd.f32 %v3587_v12, %v1567_v63 }
 0x393   : > { %v1608_v9 = vmax.f32 %v1568_v57, 0.0 }
 0x394   : > { %v1729_v1 = vpop.f32.mrf.mxu0 }
 0x395   : > { %v1730_v2 = vadd.f32 %v3645_v59, %v1729_v1 }
 0x397   : > { %v1796_v5 = vmax.f32 %v1730_v2, 0.0 }
 0x398   : > { %v1569_v6 = vpop.f32.mrf.mxu3 }
 0x399   : > { %v1840_v7 = vpack.c.bf16 %v1796_v5, %v1795_v3  ;;  %v1570_v8 = vadd.f32 %v3587_v12, %v1569_v6 }
 0x39b   : > { %v1609_v10 = vmax.f32 %v1570_v8, 0.0  ;;  %1931 = vmatmul.bf16.gmra.mxu1 %v1840_v7 }
 0x39c   : > { %v1732_v13 = vpop.f32.mrf.mxu0 }
 0x39d   : > { %v1644_v14 = vpack.c.bf16 %v1609_v10, %v1608_v9  ;;  %v1733_v16 = vadd.f32 %v3645_v59, %v1732_v13 }
 0x39f   : > { %1771 = vmatmul.bf16.gmra.mxu0 %v1644_v14  ;;  %v1797_v45 = vmax.f32 %v1733_v16, 0.0 }
 0x3a0   : > { %v1572_v15 = vpop.f32.mrf.mxu3 }
 0x3a1   : > { %v1573_v19 = vadd.f32 %v3587_v12, %v1572_v15 }
 0x3a3   : > { %v1610_v21 = vmax.f32 %v1573_v19, 0.0 }
 0x3a4   : > { %v1734_v17 = vpop.f32.mrf.mxu0 }
 0x3a5   : > { %v1735_v47 = vadd.f32 %v3645_v59, %v1734_v17 }
 0x3a7   : > { %v1798_v46 = vmax.f32 %v1735_v47, 0.0 }
 0x3a8   : > { %v1574_v49 = vpop.f32.mrf.mxu3 }
 0x3a9   : > { %v1841_v4 = vpack.c.bf16 %v1798_v46, %v1797_v45  ;;  %v1575_v20 = vadd.f32 %v3587_v12, %v1574_v49 }
 0x3ab   : > { %v1611_v22 = vmax.f32 %v1575_v20, 0.0  ;;  %1936 = vmatmul.bf16.gmra.mxu1 %v1841_v4 }
 0x3ac   : > { %v1737_v23 = vpop.f32.mrf.mxu0 }
 0x3ad   : > { %v1645_v24 = vpack.c.bf16 %v1611_v22, %v1610_v21  ;;  %v1738_v26 = vadd.f32 %v3645_v59, %v1737_v23 }
 0x3af   : > { %1776 = vmatmul.bf16.gmra.mxu0 %v1645_v24  ;;  %v1799_v30 = vmax.f32 %v1738_v26, 0.0 }
 0x3b0   : > { %v1577_v25 = vpop.f32.mrf.mxu3 }
 0x3b1   : > { %v1578_v31 = vadd.f32 %v3587_v12, %v1577_v25 }
 0x3b3   : > { %v1612_v36 = vmax.f32 %v1578_v31, 0.0 }
 0x3b4   : > { %v1739_v27 = vpop.f32.mrf.mxu0 }
 0x3b5   : > { %v1740_v28 = vadd.f32 %v3645_v59, %v1739_v27 }
 0x3b7   : > { %v1800_v32 = vmax.f32 %v1740_v28, 0.0 }
 0x3b8   : > { %v1579_v33 = vpop.f32.mrf.mxu3 }
 0x3b9   : > { %v1842_v34 = vpack.c.bf16 %v1800_v32, %v1799_v30  ;;  %v1580_v35 = vadd.f32 %v3587_v12, %v1579_v33 }
 0x3bb   : > { %v1613_v11 = vmax.f32 %v1580_v35, 0.0  ;;  %1941 = vmatmul.bf16.gmra.mxu1 %v1842_v34 }
 0x3bc   : > { %v1742_v37 = vpop.f32.mrf.mxu0 }
 0x3bd   : > { %v1646_v38 = vpack.c.bf16 %v1613_v11, %v1612_v36  ;;  %v1743_v39 = vadd.f32 %v3645_v59, %v1742_v37 }
 0x3bf   : > { %1781 = vmatmul.bf16.gmra.mxu0 %v1646_v38  ;;  %v1801_v42 = vmax.f32 %v1743_v39, 0.0 }
 0x3c4   : > { %v1744_v40 = vpop.f32.mrf.mxu0 }
 0x3c5   : > { %v1745_v41 = vadd.f32 %v3645_v59, %v1744_v40 }
 0x3c7   : > { %v1802_v43 = vmax.f32 %v1745_v41, 0.0 }
 0x3c9   : > { %v1843_v44 = vpack.c.bf16 %v1802_v43, %v1801_v42 }
 0x3cb   : > { %1946 = vmatmul.bf16.gmra.mxu1 %v1843_v44 }
 0x3cc   : > { %v1747_v48 = vpop.f32.mrf.mxu0 }
 0x3cd   : > { %v1748_v50 = vadd.f32 %v3645_v59, %v1747_v48 }
 0x3cf   : > { %v1803_v52 = vmax.f32 %v1748_v50, 0.0 }
 0x3d4   : > { %v1749_v51 = vpop.f32.mrf.mxu0 }
 0x3d5   : > { %v1750_v12 = vadd.f32 %v3645_v59, %v1749_v51 }
 0x3d7   : > { %v1804_v53 = vmax.f32 %v1750_v12, 0.0 }
 0x3d8   : > { %v1912_v54 = vpop.f32.mrf.mxu1 }
 0x3d9   : > { %v1844_v18 = vpack.c.bf16 %v1804_v53, %v1803_v52  ;;  %v1913_v55 = vadd.f32 %v3682_v29, %v1912_v54 }
 0x3db   : > { %v2889_v56 = vmul.f32 -1.442695, %v1913_v55  ;;  %1951 = vmatmul.bf16.gmra.mxu1 %v1844_v18 }
 0x3dc   : > { %v1752_v58 = vpop.f32.mrf.mxu0 }
 0x3dd   : > { %3007 = vpow2.f32 %v2889_v56  ;;  %v1753_v63 = vadd.f32 %v3645_v59, %v1752_v58 }
 0x3df   : > { %v1805_v57 = vmax.f32 %v1753_v63, 0.0 }
 0x3e0   : > { %v1914_v60 = vpop.f32.mrf.mxu1 }
 0x3e1   : > { %v1915_v61 = vadd.f32 %v3682_v29, %v1914_v60 }
 0x3e3   : > { %v3008_v62 = vpop.eup %3007  ;;  %v2890_v0 = vmul.f32 -1.442695, %v1915_v61 }
 0x3e4   : > { %v2088_v1 = vadd.f32 1.0, %v3008_v62  ;;  %v1754_v2 = vpop.f32.mrf.mxu0 }
 0x3e5   : > { %3009 = vpow2.f32 %v2890_v0  ;;  %v1755_v3 = vadd.f32 %v3645_v59, %v1754_v2 }
 0x3e6   : > { %3011 = vrcp.f32 %v2088_v1  ;;  %v2131_v47 = vand.u32 2147483648, %v2088_v1  ;;  %v2129_v46 = vand.u32 2147483647, %v2088_v1  ;;  %vm2125_vm1 = vweird.f32 %v2088_v1 }
 0x3e7   : > { %v1806_v5 = vmax.f32 %v1755_v3, 0.0 }
 0x3e8   : > { %v1917_v6 = vpop.f32.mrf.mxu1  ;;  %v2132_v23 = vor.u32 1.1754944e-38, %v2131_v47  ;;  %vm2130_vm3 = vcmp.eq.f32.partialorder %v2129_v46, 8.507059e+37 }
 0x3e9   : > { %v1845_v7 = vpack.c.bf16 %v1806_v5, %v1805_v57  ;;  %v1918_v8 = vadd.f32 %v3682_v29, %v1917_v6 }
 0x3eb   : > { %v3010_v9 = vpop.eup %3009  ;;  %v2891_v10 = vmul.f32 -1.442695, %v1918_v8  ;;  %1956 = vmatmul.bf16.gmra.mxu1 %v1845_v7 }
 0x3ec   : > { %v3012_v13 = vpop.eup %3011  ;;  %v2089_v14 = vadd.f32 1.0, %v3010_v9  ;;  %v1757_v15 = vpop.f32.mrf.mxu0 }
 0x3ed   : > { %v2121_v16 = vmul.f32 %v3012_v13, %v2088_v1  ;;  %3013 = vpow2.f32 %v2891_v10  ;;  %vm2126_vm0 = vweird.f32 %v3012_v13  ;;  %v1758_v25 = vadd.f32 %v3645_v59, %v1757_v15 }
 0x3ee   : > { %3015 = vrcp.f32 %v2089_v14  ;;  %vm2127_vm2 = vmor %vm2125_vm1, %vm2126_vm0  ;;  %v2144_v33 = vand.u32 2147483647, %v2089_v14  ;;  %v2146_v34 = vand.u32 2147483648, %v2089_v14  ;;  %vm2140_vm5 = vweird.f32 %v2089_v14 }
 0x3ef   : > { %v2122_v17 = vsub.f32 1.0, %v2121_v16  ;;  %v1807_v35 = vmax.f32 %v1758_v25, 0.0 }
 0x3f0   : > { %v1919_v45 = vpop.f32.mrf.mxu1  ;;  %v2147_v44 = vor.u32 1.1754944e-38, %v2146_v34  ;;  %vm2145_vm7 = vcmp.eq.f32.partialorder %v2144_v33, 8.507059e+37 }
 0x3f1   : > { %v2123_v19 = vmul.f32 %v3012_v13, %v2122_v17  ;;  %v1920_v49 = vadd.f32 %v3682_v29, %v1919_v45 }
 0x3f3   : > { %v3014_v4 = vpop.eup %3013  ;;  %v2124_v20 = vadd.f32 %v3012_v13, %v2123_v19  ;;  %v2892_v21 = vmul.f32 -1.442695, %v1920_v49 }
 0x3f4   : > { %v3016_v22 = vpop.eup %3015  ;;  %v2090_v24 = vadd.f32 1.0, %v3014_v4  ;;  %v1759_v26 = vpop.f32.mrf.mxu0 }
 0x3f5   : > { %v2128_v27 = vsel %vm2127_vm2, %v3012_v13, %v2124_v20  ;;  %v2136_v28 = vmul.f32 %v3016_v22, %v2089_v14  ;;  %3017 = vpow2.f32 %v2892_v21  ;;  %v1760_v32 = vadd.f32 %v3645_v59, %v1759_v26 }
 0x3f6   : > { %v2133_v30 = vsel %vm2130_vm3, %v2132_v23, %v2128_v27  ;;  %3019 = vrcp.f32 %v2090_v24  ;;  %vm2141_vm4 = vweird.f32 %v3016_v22  ;;  %v2161_v54 = vand.u32 2147483648, %v2090_v24 }
 0x3f7   : > { %2600 = vst [vmem:[%s3695_s16] sm:$0xff] %v2133_v30  ;;  %v2137_v31 = vsub.f32 1.0, %v2136_v28  ;;  %v1808_v37 = vmax.f32 %v1760_v32, 0.0  ;;  %vm2142_vm6 = vmor %vm2140_vm5, %vm2141_vm4  ;;  %v2159_v56 = vand.u32 2147483647, %v2090_v24  ;;  %vm2155_vm9 = vweird.f32 %v2090_v24 }
 0x3f8   : > { %v1922_v36 = vpop.f32.mrf.mxu1  ;;  %v2162_v0 = vor.u32 1.1754944e-38, %v2161_v54 }
 0x3f9   : > { %v2138_v11 = vmul.f32 %v3016_v22, %v2137_v31  ;;  %v1923_v38 = vadd.f32 %v3682_v29, %v1922_v36  ;;  %v1846_v41 = vpack.c.bf16 %v1808_v37, %v1807_v35  ;;  %vm2160_vm11 = vcmp.eq.f32.partialorder %v2159_v56, 8.507059e+37 }
 0x3fb   : > { %v3018_v39 = vpop.eup %3017  ;;  %v2139_v40 = vadd.f32 %v3016_v22, %v2138_v11  ;;  %v2893_v42 = vmul.f32 -1.442695, %v1923_v38  ;;  %1961 = vmatmul.bf16.gmra.mxu1 %v1846_v41 }
 0x3fc   : > { %v3020_v43 = vpop.eup %3019  ;;  %v2091_v48 = vadd.f32 1.0, %v3018_v39  ;;  %v1762_v50 = vpop.f32.mrf.mxu0 }
 0x3fd   : > { %v2143_v51 = vsel %vm2142_vm6, %v3016_v22, %v2139_v40  ;;  %v2151_v12 = vmul.f32 %v3020_v43, %v2090_v24  ;;  %3021 = vpow2.f32 %v2893_v42  ;;  %vm2156_vm8 = vweird.f32 %v3020_v43 }
 0x3fe   : > { %v2148_v52 = vsel %vm2145_vm7, %v2147_v44, %v2143_v51  ;;  %3023 = vrcp.f32 %v2091_v48  ;;  %vm2157_vm10 = vmor %vm2155_vm9, %vm2156_vm8  ;;  %v1763_v2 = vadd.f32 %v3645_v59, %v1762_v50  ;;  %v2174_v9 = vand.u32 2147483647, %v2091_v48 }
 0x3ff   : > { %2601 = vst [vmem:[%s3695_s16 + $0x8] sm:$0xff] %v2148_v52  ;;  %v2152_v53 = vsub.f32 1.0, %v2151_v12  ;;  %v2176_v10 = vand.u32 2147483648, %v2091_v48  ;;  %vm2170_vm13 = vweird.f32 %v2091_v48 }
 0x400   : > { %v1924_v18 = vpop.f32.mrf.mxu1  ;;  %v1809_v13 = vmax.f32 %v1763_v2, 0.0  ;;  %vm2175_vm15 = vcmp.eq.f32.partialorder %v2174_v9, 8.507059e+37 }
 0x401   : > { %v2153_v55 = vmul.f32 %v3020_v43, %v2152_v53  ;;  %v1925_v58 = vadd.f32 %v3682_v29, %v1924_v18  ;;  %v2177_v4 = vor.u32 1.1754944e-38, %v2176_v10 }
 0x403   : > { %v3022_v60 = vpop.eup %3021  ;;  %v2154_v61 = vadd.f32 %v3020_v43, %v2153_v55  ;;  %v2894_v62 = vmul.f32 -1.442695, %v1925_v58 }
 0x404   : > { %v3024_v63 = vpop.eup %3023  ;;  %v2092_v1 = vadd.f32 1.0, %v3022_v60  ;;  %v1764_v3 = vpop.f32.mrf.mxu0 }
 0x405   : > { %v2158_v57 = vsel %vm2157_vm10, %v3020_v43, %v2154_v61  ;;  %v2166_v5 = vmul.f32 %v3024_v63, %v2091_v48  ;;  %3025 = vpow2.f32 %v2894_v62  ;;  %v1765_v8 = vadd.f32 %v3645_v59, %v1764_v3 }
 0x406   : > { %v2163_v6 = vsel %vm2160_vm11, %v2162_v0, %v2158_v57  ;;  %3027 = vrcp.f32 %v2092_v1  ;;  %vm2171_vm12 = vweird.f32 %v3024_v63  ;;  %v2191_v26 = vand.u32 2147483648, %v2092_v1 }
 0x407   : > { %2602 = vst [vmem:[%s3695_s16 + $0x10] sm:$0xff] %v2163_v6  ;;  %v2167_v7 = vsub.f32 1.0, %v2166_v5  ;;  %v1810_v16 = vmax.f32 %v1765_v8, 0.0  ;;  %vm2172_vm14 = vmor %vm2170_vm13, %vm2171_vm12  ;;  %v2189_v30 = vand.u32 2147483647, %v2092_v1  ;;  %vm2185_vm1 = vweird.f32 %v2092_v1 }
 0x408   : > { %v1927_v14 = vpop.f32.mrf.mxu1  ;;  %v2192_v36 = vor.u32 1.1754944e-38, %v2191_v26 }
 0x409   : > { %v2168_v15 = vmul.f32 %v3024_v63, %v2167_v7  ;;  %v1928_v17 = vadd.f32 %v3682_v29, %v1927_v14  ;;  %v1847_v19 = vpack.c.bf16 %v1810_v16, %v1809_v13  ;;  %vm2190_vm3 = vcmp.eq.f32.partialorder %v2189_v30, 8.507059e+37 }
 0x40b   : > { %v3026_v47 = vpop.eup %3025  ;;  %v2169_v45 = vadd.f32 %v3024_v63, %v2168_v15  ;;  %v2895_v46 = vmul.f32 -1.442695, %v1928_v17  ;;  %1966 = vmatmul.bf16.gmra.mxu1 %v1847_v19 }
 0x40c   : > { %v3028_v49 = vpop.eup %3027  ;;  %v2093_v20 = vadd.f32 1.0, %v3026_v47  ;;  %v1767_v21 = vpop.f32.mrf.mxu0 }
 0x40d   : > { %v2173_v22 = vsel %vm2172_vm14, %v3024_v63, %v2169_v45  ;;  %v2181_v23 = vmul.f32 %v3028_v49, %v2092_v1  ;;  %3029 = vpow2.f32 %v2895_v46  ;;  %vm2186_vm0 = vweird.f32 %v3028_v49 }
 0x40e   : > { %v2178_v24 = vsel %vm2175_vm15, %v2177_v4, %v2173_v22  ;;  %3031 = vrcp.f32 %v2093_v20  ;;  %vm2187_vm2 = vmor %vm2185_vm1, %vm2186_vm0  ;;  %v1768_v37 = vadd.f32 %v3645_v59, %v1767_v21  ;;  %v2204_v44 = vand.u32 2147483647, %v2093_v20 }
 0x40f   : > { %2603 = vst [vmem:[%s3695_s16 + $0x18] sm:$0xff] %v2178_v24  ;;  %v2182_v25 = vsub.f32 1.0, %v2181_v23  ;;  %v2206_v48 = vand.u32 2147483648, %v2093_v20  ;;  %vm2200_vm5 = vweird.f32 %v2093_v20 }
 0x410   : > { %v1929_v27 = vpop.f32.mrf.mxu1  ;;  %v1811_v50 = vmax.f32 %v1768_v37, 0.0  ;;  %vm2205_vm7 = vcmp.eq.f32.partialorder %v2204_v44, 8.507059e+37 }
 0x411   : > { %v2183_v28 = vmul.f32 %v3028_v49, %v2182_v25  ;;  %v1930_v31 = vadd.f32 %v3682_v29, %v1929_v27  ;;  %v2207_v60 = vor.u32 1.1754944e-38, %v2206_v48 }
 0x413   : > { %v3030_v32 = vpop.eup %3029  ;;  %v2184_v33 = vadd.f32 %v3028_v49, %v2183_v28  ;;  %v2896_v34 = vmul.f32 -1.442695, %v1930_v31 }
 0x414   : > { %v3032_v35 = vpop.eup %3031  ;;  %v2094_v11 = vadd.f32 1.0, %v3030_v32  ;;  %v1769_v38 = vpop.f32.mrf.mxu0 }
 0x415   : > { %v2188_v39 = vsel %vm2187_vm2, %v3028_v49, %v2184_v33  ;;  %v2196_v40 = vmul.f32 %v3032_v35, %v2093_v20  ;;  %3033 = vpow2.f32 %v2896_v34  ;;  %v1770_v43 = vadd.f32 %v3645_v59, %v1769_v38 }
 0x416   : > { %v2193_v41 = vsel %vm2190_vm3, %v2192_v36, %v2188_v39  ;;  %3035 = vrcp.f32 %v2094_v11  ;;  %vm2201_vm4 = vweird.f32 %v3032_v35  ;;  %v2221_v3 = vand.u32 2147483648, %v2094_v11 }
 0x417   : > { %2604 = vst [vmem:[%s3695_s16 + $0x20] sm:$0xff] %v2193_v41  ;;  %v2197_v42 = vsub.f32 1.0, %v2196_v40  ;;  %v1812_v52 = vmax.f32 %v1770_v43, 0.0  ;;  %vm2202_vm6 = vmor %vm2200_vm5, %vm2201_vm4  ;;  %v2219_v6 = vand.u32 2147483647, %v2094_v11  ;;  %vm2215_vm9 = vweird.f32 %v2094_v11 }
 0x418   : > { %v1932_v51 = vpop.f32.mrf.mxu1  ;;  %v2222_v14 = vor.u32 1.1754944e-38, %v2221_v3 }
 0x419   : > { %v2198_v12 = vmul.f32 %v3032_v35, %v2197_v42  ;;  %v1933_v53 = vadd.f32 %v3682_v29, %v1932_v51  ;;  %v1848_v55 = vpack.c.bf16 %v1812_v52, %v1811_v50  ;;  %vm2220_vm11 = vcmp.eq.f32.partialorder %v2219_v6, 8.507059e+37 }
 0x41b   : > { %v3034_v54 = vpop.eup %3033  ;;  %v2199_v18 = vadd.f32 %v3032_v35, %v2198_v12  ;;  %v2897_v56 = vmul.f32 -1.442695, %v1933_v53  ;;  %1971 = vmatmul.bf16.gmra.mxu1 %v1848_v55 }
 0x41c   : > { %v3036_v58 = vpop.eup %3035  ;;  %v2095_v61 = vadd.f32 1.0, %v3034_v54  ;;  %v1772_v62 = vpop.f32.mrf.mxu0 }
 0x41d   : > { %v2203_v63 = vsel %vm2202_vm6, %v3032_v35, %v2199_v18  ;;  %v2211_v0 = vmul.f32 %v3036_v58, %v2094_v11  ;;  %3037 = vpow2.f32 %v2897_v56  ;;  %vm2216_vm8 = vweird.f32 %v3036_v58 }
 0x41e   : > { %v2208_v1 = vsel %vm2205_vm7, %v2207_v60, %v2203_v63  ;;  %3039 = vrcp.f32 %v2095_v61  ;;  %vm2217_vm10 = vmor %vm2215_vm9, %vm2216_vm8  ;;  %v1773_v16 = vadd.f32 %v3645_v59, %v1772_v62  ;;  %v2234_v4 = vand.u32 2147483647, %v2095_v61 }
 0x41f   : > { %2605 = vst [vmem:[%s3695_s16 + $0x28] sm:$0xff] %v2208_v1  ;;  %v2212_v2 = vsub.f32 1.0, %v2211_v0  ;;  %v2236_v20 = vand.u32 2147483648, %v2095_v61  ;;  %vm2230_vm13 = vweird.f32 %v2095_v61 }
 0x420   : > { %v1934_v57 = vpop.f32.mrf.mxu1  ;;  %v1813_v21 = vmax.f32 %v1773_v16, 0.0  ;;  %vm2235_vm15 = vcmp.eq.f32.partialorder %v2234_v4, 8.507059e+37 }
 0x421   : > { %v2213_v5 = vmul.f32 %v3036_v58, %v2212_v2  ;;  %v1935_v7 = vadd.f32 %v3682_v29, %v1934_v57  ;;  %v2237_v32 = vor.u32 1.1754944e-38, %v2236_v20 }
 0x423   : > { %v3038_v8 = vpop.eup %3037  ;;  %v2214_v9 = vadd.f32 %v3036_v58, %v2213_v5  ;;  %v2898_v10 = vmul.f32 -1.442695, %v1935_v7 }
 0x424   : > { %v3040_v13 = vpop.eup %3039  ;;  %v2096_v15 = vadd.f32 1.0, %v3038_v8  ;;  %v1774_v17 = vpop.f32.mrf.mxu0 }
 0x425   : > { %v2218_v47 = vsel %vm2217_vm10, %v3036_v58, %v2214_v9  ;;  %v2226_v45 = vmul.f32 %v3040_v13, %v2095_v61  ;;  %3041 = vpow2.f32 %v2898_v10  ;;  %v1775_v49 = vadd.f32 %v3645_v59, %v1774_v17 }
 0x426   : > { %v2223_v19 = vsel %vm2220_vm11, %v2222_v14, %v2218_v47  ;;  %3043 = vrcp.f32 %v2096_v15  ;;  %vm2231_vm12 = vweird.f32 %v3040_v13  ;;  %v2251_v38 = vand.u32 2147483648, %v2096_v15 }
 0x427   : > { %2606 = vst [vmem:[%s3695_s16 + $0x30] sm:$0xff] %v2223_v19  ;;  %v2227_v46 = vsub.f32 1.0, %v2226_v45  ;;  %v1814_v24 = vmax.f32 %v1775_v49, 0.0  ;;  %vm2232_vm14 = vmor %vm2230_vm13, %vm2231_vm12  ;;  %v2249_v41 = vand.u32 2147483647, %v2096_v15  ;;  %vm2245_vm1 = vweird.f32 %v2096_v15 }
 0x428   : > { %v1937_v22 = vpop.f32.mrf.mxu1  ;;  %v2252_v51 = vor.u32 1.1754944e-38, %v2251_v38 }
 0x429   : > { %v2228_v23 = vmul.f32 %v3040_v13, %v2227_v46  ;;  %v1938_v25 = vadd.f32 %v3682_v29, %v1937_v22  ;;  %v1849_v28 = vpack.c.bf16 %v1814_v24, %v1813_v21  ;;  %vm2250_vm3 = vcmp.eq.f32.partialorder %v2249_v41, 8.507059e+37 }
 0x42b   : > { %v3042_v26 = vpop.eup %3041  ;;  %v2229_v27 = vadd.f32 %v3040_v13, %v2228_v23  ;;  %v2899_v30 = vmul.f32 -1.442695, %v1938_v25  ;;  %1976 = vmatmul.bf16.gmra.mxu1 %v1849_v28 }
 0x42c   : > { %v3044_v31 = vpop.eup %3043  ;;  %v2097_v33 = vadd.f32 1.0, %v3042_v26  ;;  %v1777_v34 = vpop.f32.mrf.mxu0 }
 0x42d   : > { %v2233_v35 = vsel %vm2232_vm14, %v3040_v13, %v2229_v27  ;;  %v2241_v36 = vmul.f32 %v3044_v31, %v2096_v15  ;;  %3045 = vpow2.f32 %v2899_v30  ;;  %vm2246_vm0 = vweird.f32 %v3044_v31 }
 0x42e   : > { %v2238_v11 = vsel %vm2235_vm15, %v2237_v32, %v2233_v35  ;;  %3047 = vrcp.f32 %v2097_v33  ;;  %vm2247_vm2 = vmor %vm2245_vm1, %vm2246_vm0  ;;  %v1778_v52 = vadd.f32 %v3645_v59, %v1777_v34  ;;  %v2264_v60 = vand.u32 2147483647, %v2097_v33 }
 0x42f   : > { %2607 = vst [vmem:[%s3695_s16 + $0x38] sm:$0xff] %v2238_v11  ;;  %v2242_v37 = vsub.f32 1.0, %v2241_v36  ;;  %v2266_v61 = vand.u32 2147483648, %v2097_v33  ;;  %vm2260_vm5 = vweird.f32 %v2097_v33 }
 0x430   : > { %v1939_v39 = vpop.f32.mrf.mxu1  ;;  %v1815_v62 = vmax.f32 %v1778_v52, 0.0  ;;  %vm2265_vm7 = vcmp.eq.f32.partialorder %v2264_v60, 8.507059e+37 }
 0x431   : > { %v2243_v40 = vmul.f32 %v3044_v31, %v2242_v37  ;;  %v1940_v42 = vadd.f32 %v3682_v29, %v1939_v39  ;;  %v2267_v8 = vor.u32 1.1754944e-38, %v2266_v61 }
 0x433   : > { %v3046_v43 = vpop.eup %3045  ;;  %v2244_v44 = vadd.f32 %v3044_v31, %v2243_v40  ;;  %v2900_v48 = vmul.f32 -1.442695, %v1940_v42 }
 0x434   : > { %v3048_v50 = vpop.eup %3047  ;;  %v2098_v12 = vadd.f32 1.0, %v3046_v43  ;;  %v1779_v53 = vpop.f32.mrf.mxu0 }
 0x435   : > { %v2248_v54 = vsel %vm2247_vm2, %v3044_v31, %v2244_v44  ;;  %v2256_v18 = vmul.f32 %v3048_v50, %v2097_v33  ;;  %3049 = vpow2.f32 %v2900_v48  ;;  %v1780_v58 = vadd.f32 %v3645_v59, %v1779_v53 }
 0x436   : > { %v2253_v55 = vsel %vm2250_vm3, %v2252_v51, %v2248_v54  ;;  %3051 = vrcp.f32 %v2098_v12  ;;  %vm2261_vm4 = vweird.f32 %v3048_v50  ;;  %v2281_v17 = vand.u32 2147483648, %v2098_v12 }
 0x437   : > { %2608 = vst [vmem:[%s3695_s16 + $0x40] sm:$0xff] %v2253_v55  ;;  %v2257_v56 = vsub.f32 1.0, %v2256_v18  ;;  %v1816_v1 = vmax.f32 %v1780_v58, 0.0  ;;  %vm2262_vm6 = vmor %vm2260_vm5, %vm2261_vm4  ;;  %v2279_v19 = vand.u32 2147483647, %v2098_v12  ;;  %vm2275_vm9 = vweird.f32 %v2098_v12 }
 0x438   : > { %v1942_v63 = vpop.f32.mrf.mxu1  ;;  %v2282_v22 = vor.u32 1.1754944e-38, %v2281_v17 }
 0x439   : > { %v2258_v0 = vmul.f32 %v3048_v50, %v2257_v56  ;;  %v1943_v2 = vadd.f32 %v3682_v29, %v1942_v63  ;;  %v1850_v5 = vpack.c.bf16 %v1816_v1, %v1815_v62  ;;  %vm2280_vm11 = vcmp.eq.f32.partialorder %v2279_v19, 8.507059e+37 }
 0x43b   : > { %v3050_v3 = vpop.eup %3049  ;;  %v2259_v57 = vadd.f32 %v3048_v50, %v2258_v0  ;;  %v2901_v6 = vmul.f32 -1.442695, %v1943_v2  ;;  %1981 = vmatmul.bf16.gmra.mxu1 %v1850_v5 }
 0x43c   : > { %v3052_v7 = vpop.eup %3051  ;;  %v2099_v9 = vadd.f32 1.0, %v3050_v3  ;;  %v1782_v10 = vpop.f32.mrf.mxu0 }
 0x43d   : > { %v2263_v13 = vsel %vm2262_vm6, %v3048_v50, %v2259_v57  ;;  %v2271_v14 = vmul.f32 %v3052_v7, %v2098_v12  ;;  %3053 = vpow2.f32 %v2901_v6  ;;  %vm2276_vm8 = vweird.f32 %v3052_v7 }
 0x43e   : > { %v2268_v15 = vsel %vm2265_vm7, %v2267_v8, %v2263_v13  ;;  %3055 = vrcp.f32 %v2099_v9  ;;  %vm2277_vm10 = vmor %vm2275_vm9, %vm2276_vm8  ;;  %v1783_v24 = vadd.f32 %v3645_v59, %v1782_v10  ;;  %v2294_v32 = vand.u32 2147483647, %v2099_v9 }
 0x43f   : > { %2609 = vst [vmem:[%s3695_s16 + $0x48] sm:$0xff] %v2268_v15  ;;  %v2272_v16 = vsub.f32 1.0, %v2271_v14  ;;  %v2296_v33 = vand.u32 2147483648, %v2099_v9  ;;  %vm2290_vm13 = vweird.f32 %v2099_v9 }
 0x440   : > { %v1944_v47 = vpop.f32.mrf.mxu1  ;;  %v1817_v34 = vmax.f32 %v1783_v24, 0.0  ;;  %vm2295_vm15 = vcmp.eq.f32.partialorder %v2294_v32, 8.507059e+37 }
 0x441   : > { %v2273_v45 = vmul.f32 %v3052_v7, %v2272_v16  ;;  %v1945_v46 = vadd.f32 %v3682_v29, %v1944_v47  ;;  %v2297_v43 = vor.u32 1.1754944e-38, %v2296_v33 }
 0x443   : > { %v3054_v49 = vpop.eup %3053  ;;  %v2274_v4 = vadd.f32 %v3052_v7, %v2273_v45  ;;  %v2902_v20 = vmul.f32 -1.442695, %v1945_v46 }
 0x444   : > { %v3056_v21 = vpop.eup %3055  ;;  %v2100_v23 = vadd.f32 1.0, %v3054_v49  ;;  %v1784_v25 = vpop.f32.mrf.mxu0 }
 0x445   : > { %v2278_v26 = vsel %vm2277_vm10, %v3052_v7, %v2274_v4  ;;  %v2286_v27 = vmul.f32 %v3056_v21, %v2099_v9  ;;  %3057 = vpow2.f32 %v2902_v20  ;;  %v1785_v31 = vadd.f32 %v3645_v59, %v1784_v25 }
 0x446   : > { %v2283_v28 = vsel %vm2280_vm11, %v2282_v22, %v2278_v26  ;;  %3059 = vrcp.f32 %v2100_v23  ;;  %vm2291_vm12 = vweird.f32 %v3056_v21  ;;  %v2311_v12 = vand.u32 2147483648, %v2100_v23 }
 0x447   : > { %2610 = vst [vmem:[%s3695_s16 + $0x50] sm:$0xff] %v2283_v28  ;;  %v2287_v30 = vsub.f32 1.0, %v2286_v27  ;;  %v1818_v11 = vmax.f32 %v1785_v31, 0.0  ;;  %vm2292_vm14 = vmor %vm2290_vm13, %vm2291_vm12  ;;  %v2309_v54 = vand.u32 2147483647, %v2100_v23  ;;  %vm2305_vm1 = vweird.f32 %v2100_v23 }
 0x448   : > { %v1947_v35 = vpop.f32.mrf.mxu1  ;;  %v2312_v61 = vor.u32 1.1754944e-38, %v2311_v12 }
 0x449   : > { %v2288_v36 = vmul.f32 %v3056_v21, %v2287_v30  ;;  %v1948_v37 = vadd.f32 %v3682_v29, %v1947_v35  ;;  %v1851_v40 = vpack.c.bf16 %v1818_v11, %v1817_v34  ;;  %vm2310_vm3 = vcmp.eq.f32.partialorder %v2309_v54, 8.507059e+37 }
 0x44b   : > { %v3058_v38 = vpop.eup %3057  ;;  %v2289_v39 = vadd.f32 %v3056_v21, %v2288_v36  ;;  %v2903_v41 = vmul.f32 -1.442695, %v1948_v37  ;;  %1986 = vmatmul.bf16.gmra.mxu1 %v1851_v40 }
 0x44c   : > { %v3060_v42 = vpop.eup %3059  ;;  %v2101_v44 = vadd.f32 1.0, %v3058_v38 }
 0x44d   : > { %v2293_v59 = vsel %vm2292_vm14, %v3056_v21, %v2289_v39  ;;  %v2301_v48 = vmul.f32 %v3060_v42, %v2100_v23  ;;  %3061 = vpow2.f32 %v2903_v41  ;;  %vm2306_vm0 = vweird.f32 %v3060_v42 }
 0x44e   : > { %v2298_v50 = vsel %vm2295_vm15, %v2297_v43, %v2293_v59  ;;  %3063 = vrcp.f32 %v2101_v44  ;;  %vm2307_vm2 = vmor %vm2305_vm1, %vm2306_vm0  ;;  %v2326_v3 = vand.u32 2147483648, %v2101_v44  ;;  %v2324_v6 = vand.u32 2147483647, %v2101_v44 }
 0x44f   : > { %2611 = vst [vmem:[%s3695_s16 + $0x58] sm:$0xff] %v2298_v50  ;;  %v2302_v51 = vsub.f32 1.0, %v2301_v48  ;;  %vm2320_vm5 = vweird.f32 %v2101_v44 }
 0x450   : > { %v1949_v52 = vpop.f32.mrf.mxu1  ;;  %v2327_v14 = vor.u32 1.1754944e-38, %v2326_v3  ;;  %vm2325_vm7 = vcmp.eq.f32.partialorder %v2324_v6, 8.507059e+37 }
 0x451   : > { %v2303_v53 = vmul.f32 %v3060_v42, %v2302_v51  ;;  %v1950_v18 = vadd.f32 %v3682_v29, %v1949_v52 }
 0x453   : > { %v3062_v55 = vpop.eup %3061  ;;  %v2304_v56 = vadd.f32 %v3060_v42, %v2303_v53  ;;  %v2904_v58 = vmul.f32 -1.442695, %v1950_v18 }
 0x454   : > { %v3064_v60 = vpop.eup %3063  ;;  %v2102_v62 = vadd.f32 1.0, %v3062_v55 }
 0x455   : > { %v2308_v63 = vsel %vm2307_vm2, %v3060_v42, %v2304_v56  ;;  %v2316_v0 = vmul.f32 %v3064_v60, %v2101_v44  ;;  %3065 = vpow2.f32 %v2904_v58  ;;  %vm2321_vm4 = vweird.f32 %v3064_v60 }
 0x456   : > { %v2313_v1 = vsel %vm2310_vm3, %v2312_v61, %v2308_v63  ;;  %3067 = vrcp.f32 %v2102_v62  ;;  %vm2322_vm6 = vmor %vm2320_vm5, %vm2321_vm4  ;;  %v2341_v19 = vand.u32 2147483648, %v2102_v62  ;;  %v2339_v4 = vand.u32 2147483647, %v2102_v62 }
 0x457   : > { %2612 = vst [vmem:[%s3695_s16 + $0x60] sm:$0xff] %v2313_v1  ;;  %v2317_v2 = vsub.f32 1.0, %v2316_v0  ;;  %vm2335_vm9 = vweird.f32 %v2102_v62 }
 0x458   : > { %v1952_v57 = vpop.f32.mrf.mxu1  ;;  %v2342_v25 = vor.u32 1.1754944e-38, %v2341_v19  ;;  %vm2340_vm11 = vcmp.eq.f32.partialorder %v2339_v4, 8.507059e+37 }
 0x459   : > { %v2318_v5 = vmul.f32 %v3064_v60, %v2317_v2  ;;  %v1953_v7 = vadd.f32 %v3682_v29, %v1952_v57 }
 0x45b   : > { %v3066_v8 = vpop.eup %3065  ;;  %v2319_v9 = vadd.f32 %v3064_v60, %v2318_v5  ;;  %v2905_v10 = vmul.f32 -1.442695, %v1953_v7 }
 0x45c   : > { %v3068_v13 = vpop.eup %3067  ;;  %v2103_v15 = vadd.f32 1.0, %v3066_v8 }
 0x45d   : > { %v2323_v16 = vsel %vm2322_vm6, %v3064_v60, %v2319_v9  ;;  %v2331_v17 = vmul.f32 %v3068_v13, %v2102_v62  ;;  %3069 = vpow2.f32 %v2905_v10  ;;  %vm2336_vm8 = vweird.f32 %v3068_v13 }
 0x45e   : > { %v2328_v47 = vsel %vm2325_vm7, %v2327_v14, %v2323_v16  ;;  %3071 = vrcp.f32 %v2103_v15  ;;  %vm2337_vm10 = vmor %vm2335_vm9, %vm2336_vm8  ;;  %v2356_v32 = vand.u32 2147483648, %v2103_v15  ;;  %v2354_v35 = vand.u32 2147483647, %v2103_v15 }
 0x45f   : > { %2613 = vst [vmem:[%s3695_s16 + $0x68] sm:$0xff] %v2328_v47  ;;  %v2332_v45 = vsub.f32 1.0, %v2331_v17  ;;  %vm2350_vm13 = vweird.f32 %v2103_v15 }
 0x460   : > { %v1954_v46 = vpop.f32.mrf.mxu1  ;;  %v2357_v40 = vor.u32 1.1754944e-38, %v2356_v32  ;;  %vm2355_vm15 = vcmp.eq.f32.partialorder %v2354_v35, 8.507059e+37 }
 0x461   : > { %v2333_v49 = vmul.f32 %v3068_v13, %v2332_v45  ;;  %v1955_v20 = vadd.f32 %v3682_v29, %v1954_v46 }
 0x463   : > { %v3070_v21 = vpop.eup %3069  ;;  %v2334_v22 = vadd.f32 %v3068_v13, %v2333_v49  ;;  %v2906_v23 = vmul.f32 -1.442695, %v1955_v20 }
 0x464   : > { %v3072_v24 = vpop.eup %3071  ;;  %v2104_v26 = vadd.f32 1.0, %v3070_v21 }
 0x465   : > { %v2338_v27 = vsel %vm2337_vm10, %v3068_v13, %v2334_v22  ;;  %v2346_v28 = vmul.f32 %v3072_v24, %v2103_v15  ;;  %3073 = vpow2.f32 %v2906_v23  ;;  %vm2351_vm12 = vweird.f32 %v3072_v24 }
 0x466   : > { %v2343_v30 = vsel %vm2340_vm11, %v2342_v25, %v2338_v27  ;;  %3075 = vrcp.f32 %v2104_v26  ;;  %vm2352_vm14 = vmor %vm2350_vm13, %vm2351_vm12  ;;  %v2371_v48 = vand.u32 2147483648, %v2104_v26  ;;  %v2369_v12 = vand.u32 2147483647, %v2104_v26 }
 0x467   : > { %2614 = vst [vmem:[%s3695_s16 + $0x70] sm:$0xff] %v2343_v30  ;;  %v2347_v31 = vsub.f32 1.0, %v2346_v28  ;;  %vm2365_vm1 = vweird.f32 %v2104_v26 }
 0x468   : > { %v1957_v33 = vpop.f32.mrf.mxu1  ;;  %v2372_v56 = vor.u32 1.1754944e-38, %v2371_v48  ;;  %vm2370_vm3 = vcmp.eq.f32.partialorder %v2369_v12, 8.507059e+37 }
 0x469   : > { %v2348_v34 = vmul.f32 %v3072_v24, %v2347_v31  ;;  %v1958_v36 = vadd.f32 %v3682_v29, %v1957_v33 }
 0x46b   : > { %v3074_v11 = vpop.eup %3073  ;;  %v2349_v37 = vadd.f32 %v3072_v24, %v2348_v34  ;;  %v2907_v38 = vmul.f32 -1.442695, %v1958_v36 }
 0x46c   : > { %v3076_v39 = vpop.eup %3075  ;;  %v2105_v41 = vadd.f32 1.0, %v3074_v11 }
 0x46d   : > { %v2353_v42 = vsel %vm2352_vm14, %v3072_v24, %v2349_v37  ;;  %v2361_v43 = vmul.f32 %v3076_v39, %v2104_v26  ;;  %3077 = vpow2.f32 %v2907_v38  ;;  %vm2366_vm0 = vweird.f32 %v3076_v39 }
 0x46e   : > { %v2358_v44 = vsel %vm2355_vm15, %v2357_v40, %v2353_v42  ;;  %3079 = vrcp.f32 %v2105_v41  ;;  %vm2367_vm2 = vmor %vm2365_vm1, %vm2366_vm0  ;;  %v2386_v0 = vand.u32 2147483648, %v2105_v41  ;;  %v2384_v2 = vand.u32 2147483647, %v2105_v41 }
 0x46f   : > { %2615 = vst [vmem:[%s3695_s16 + $0x78] sm:$0xff] %v2358_v44  ;;  %v2362_v59 = vsub.f32 1.0, %v2361_v43  ;;  %vm2380_vm5 = vweird.f32 %v2105_v41 }
 0x470   : > { %v1959_v50 = vpop.f32.mrf.mxu1  ;;  %v2387_v8 = vor.u32 1.1754944e-38, %v2386_v0  ;;  %vm2385_vm7 = vcmp.eq.f32.partialorder %v2384_v2, 8.507059e+37 }
 0x471   : > { %v2363_v51 = vmul.f32 %v3076_v39, %v2362_v59  ;;  %v1960_v52 = vadd.f32 %v3682_v29, %v1959_v50 }
 0x473   : > { %v3078_v53 = vpop.eup %3077  ;;  %v2364_v54 = vadd.f32 %v3076_v39, %v2363_v51  ;;  %v2908_v18 = vmul.f32 -1.442695, %v1960_v52 }
 0x474   : > { %v3080_v55 = vpop.eup %3079  ;;  %v2106_v58 = vadd.f32 1.0, %v3078_v53 }
 0x475   : > { %v2368_v60 = vsel %vm2367_vm2, %v3076_v39, %v2364_v54  ;;  %v2376_v61 = vmul.f32 %v3080_v55, %v2105_v41  ;;  %3081 = vpow2.f32 %v2908_v18  ;;  %vm2381_vm4 = vweird.f32 %v3080_v55 }
 0x476   : > { %v2373_v62 = vsel %vm2370_vm3, %v2372_v56, %v2368_v60  ;;  %3083 = vrcp.f32 %v2106_v58  ;;  %vm2382_vm6 = vmor %vm2380_vm5, %vm2381_vm4  ;;  %v2401_v17 = vand.u32 2147483648, %v2106_v58  ;;  %v2399_v45 = vand.u32 2147483647, %v2106_v58 }
 0x477   : > { %2616 = vst [vmem:[%s3695_s16 + $0x80] sm:$0xff] %v2373_v62  ;;  %v2377_v63 = vsub.f32 1.0, %v2376_v61  ;;  %vm2395_vm9 = vweird.f32 %v2106_v58 }
 0x478   : > { %v1962_v3 = vpop.f32.mrf.mxu1  ;;  %v2402_v20 = vor.u32 1.1754944e-38, %v2401_v17  ;;  %vm2400_vm11 = vcmp.eq.f32.partialorder %v2399_v45, 8.507059e+37 }
 0x479   : > { %v2378_v1 = vmul.f32 %v3080_v55, %v2377_v63  ;;  %v1963_v6 = vadd.f32 %v3682_v29, %v1962_v3 }
 0x47b   : > { %v3082_v57 = vpop.eup %3081  ;;  %v2379_v5 = vadd.f32 %v3080_v55, %v2378_v1  ;;  %v2909_v14 = vmul.f32 -1.442695, %v1963_v6 }
 0x47c   : > { %v3084_v7 = vpop.eup %3083  ;;  %v2107_v9 = vadd.f32 1.0, %v3082_v57 }
 0x47d   : > { %v2383_v10 = vsel %vm2382_vm6, %v3080_v55, %v2379_v5  ;;  %v2391_v13 = vmul.f32 %v3084_v7, %v2106_v58  ;;  %vm2396_vm8 = vweird.f32 %v3084_v7 }
 0x47e   : > { %v2388_v15 = vsel %vm2385_vm7, %v2387_v8, %v2383_v10  ;;  %3085 = vrcp.f32 %v2107_v9  ;;  %vm2397_vm10 = vmor %vm2395_vm9, %vm2396_vm8  ;;  %v2416_v28 = vand.u32 2147483648, %v2107_v9  ;;  %v2414_v31 = vand.u32 2147483647, %v2107_v9 }
 0x47f   : > { %2617 = vst [vmem:[%s3695_s16 + $0x88] sm:$0xff] %v2388_v15  ;;  %v2392_v16 = vsub.f32 1.0, %v2391_v13  ;;  %3087 = vpow2.f32 %v2909_v14  ;;  %vm2410_vm13 = vweird.f32 %v2107_v9 }
 0x480   : > { %v1964_v19 = vpop.f32.mrf.mxu1  ;;  %v2417_v35 = vor.u32 1.1754944e-38, %v2416_v28  ;;  %vm2415_vm15 = vcmp.eq.f32.partialorder %v2414_v31, 8.507059e+37 }
 0x481   : > { %v2393_v47 = vmul.f32 %v3084_v7, %v2392_v16  ;;  %v1965_v49 = vadd.f32 %v3682_v29, %v1964_v19 }
 0x483   : > { %v2394_v46 = vadd.f32 %v3084_v7, %v2393_v47  ;;  %v2910_v24 = vmul.f32 -1.442695, %v1965_v49 }
 0x484   : > { %v3086_v4 = vpop.eup %3085 }
 0x485   : > { %v3088_v21 = vpop.eup %3087  ;;  %v2398_v22 = vsel %vm2397_vm10, %v3084_v7, %v2394_v46  ;;  %v2406_v23 = vmul.f32 %v3086_v4, %v2107_v9  ;;  %3089 = vpow2.f32 %v2910_v24  ;;  %vm2411_vm12 = vweird.f32 %v3086_v4 }
 0x486   : > { %v2403_v25 = vsel %vm2400_vm11, %v2402_v20, %v2398_v22  ;;  %v2108_v26 = vadd.f32 1.0, %v3088_v21  ;;  %vm2412_vm14 = vmor %vm2410_vm13, %vm2411_vm12 }
 0x487   : > { %2618 = vst [vmem:[%s3695_s16 + $0x90] sm:$0xff] %v2403_v25  ;;  %v2407_v27 = vsub.f32 1.0, %v2406_v23 }
 0x488   : > { %3091 = vrcp.f32 %v2108_v26  ;;  %v1967_v32 = vpop.f32.mrf.mxu1  ;;  %v2431_v43 = vand.u32 2147483648, %v2108_v26  ;;  %v2429_v48 = vand.u32 2147483647, %v2108_v26  ;;  %vm2425_vm1 = vweird.f32 %v2108_v26 }
 0x489   : > { %v2408_v30 = vmul.f32 %v3086_v4, %v2407_v27  ;;  %v1968_v34 = vadd.f32 %v3682_v29, %v1967_v32  ;;  %v3751_v29 = vld [vmem:[%s3791_s14] ss:$0 sm:$0xff] }
 0x48a   : > { %v2432_v54 = vor.u32 1.1754944e-38, %v2431_v43  ;;  %vm2430_vm3 = vcmp.eq.f32.partialorder %v2429_v48, 8.507059e+37 }
 0x48b   : > { %v2409_v33 = vadd.f32 %v3086_v4, %v2408_v30  ;;  %v3090_v36 = vpop.eup %3089  ;;  %v2911_v37 = vmul.f32 -1.442695, %v1968_v34 }
 0x48c   : > { %v2109_v40 = vadd.f32 1.0, %v3090_v36 }
 0x48d   : > { %v2413_v11 = vsel %vm2412_vm14, %v3086_v4, %v2409_v33  ;;  %3093 = vpow2.f32 %v2911_v37 }
 0x48e   : > { %v3092_v38 = vpop.eup %3091  ;;  %v2418_v39 = vsel %vm2415_vm15, %v2417_v35, %v2413_v11  ;;  %3095 = vrcp.f32 %v2109_v40  ;;  %v2446_v61 = vand.u32 2147483648, %v2109_v40  ;;  %v2444_v0 = vand.u32 2147483647, %v2109_v40 }
 0x48f   : > { %2619 = vst [vmem:[%s3695_s16 + $0x98] sm:$0xff] %v2418_v39  ;;  %v2421_v41 = vmul.f32 %v3092_v38, %v2108_v26  ;;  %vm2426_vm0 = vweird.f32 %v3092_v38  ;;  %vm2440_vm5 = vweird.f32 %v2109_v40 }
 0x490   : > { %v1969_v44 = vpop.f32.mrf.mxu1  ;;  %vm2427_vm2 = vmor %vm2425_vm1, %vm2426_vm0  ;;  %v2447_v6 = vor.u32 1.1754944e-38, %v2446_v61  ;;  %vm2445_vm7 = vcmp.eq.f32.partialorder %v2444_v0, 8.507059e+37 }
 0x491   : > { %v2422_v42 = vsub.f32 1.0, %v2421_v41  ;;  %v1970_v50 = vadd.f32 %v3751_v29, %v1969_v44 }
 0x493   : > { %v2423_v59 = vmul.f32 %v3092_v38, %v2422_v42  ;;  %v3094_v51 = vpop.eup %3093  ;;  %v2912_v52 = vmul.f32 -1.442695, %v1970_v50 }
 0x494   : > { %v3096_v53 = vpop.eup %3095  ;;  %v2110_v18 = vadd.f32 1.0, %v3094_v51 }
 0x495   : > { %v2424_v12 = vadd.f32 %v3092_v38, %v2423_v59  ;;  %v2436_v56 = vmul.f32 %v3096_v53, %v2109_v40  ;;  %3097 = vpow2.f32 %v2912_v52  ;;  %vm2441_vm4 = vweird.f32 %v3096_v53 }
 0x496   : > { %3099 = vrcp.f32 %v2110_v18  ;;  %vm2442_vm6 = vmor %vm2440_vm5, %vm2441_vm4  ;;  %v2461_v14 = vand.u32 2147483648, %v2110_v18  ;;  %v2459_v17 = vand.u32 2147483647, %v2110_v18  ;;  %vm2455_vm9 = vweird.f32 %v2110_v18 }
 0x497   : > { %v2428_v55 = vsel %vm2427_vm2, %v3092_v38, %v2424_v12  ;;  %v2437_v60 = vsub.f32 1.0, %v2436_v56 }
 0x498   : > { %v2433_v58 = vsel %vm2430_vm3, %v2432_v54, %v2428_v55  ;;  %v1972_v62 = vpop.f32.mrf.mxu1  ;;  %v2462_v4 = vor.u32 1.1754944e-38, %v2461_v14  ;;  %vm2460_vm11 = vcmp.eq.f32.partialorder %v2459_v17, 8.507059e+37 }
 0x499   : > { %2620 = vst [vmem:[%s3695_s16 + $0xa0] sm:$0xff] %v2433_v58  ;;  %v2438_v63 = vmul.f32 %v3096_v53, %v2437_v60  ;;  %v1973_v1 = vadd.f32 %v3751_v29, %v1972_v62 }
 0x49b   : > { %v3098_v2 = vpop.eup %3097  ;;  %v2439_v3 = vadd.f32 %v3096_v53, %v2438_v63  ;;  %v2913_v57 = vmul.f32 -1.442695, %v1973_v1 }
 0x49c   : > { %v3100_v5 = vpop.eup %3099  ;;  %v2111_v7 = vadd.f32 1.0, %v3098_v2 }
 0x49d   : > { %v2443_v8 = vsel %vm2442_vm6, %v3096_v53, %v2439_v3  ;;  %v2451_v9 = vmul.f32 %v3100_v5, %v2110_v18  ;;  %3101 = vpow2.f32 %v2913_v57  ;;  %vm2456_vm8 = vweird.f32 %v3100_v5 }
 0x49e   : > { %v2448_v10 = vsel %vm2445_vm7, %v2447_v6, %v2443_v8  ;;  %3103 = vrcp.f32 %v2111_v7  ;;  %vm2457_vm10 = vmor %vm2455_vm9, %vm2456_vm8  ;;  %v2476_v25 = vand.u32 2147483648, %v2111_v7  ;;  %v2474_v28 = vand.u32 2147483647, %v2111_v7 }
 0x49f   : > { %2621 = vst [vmem:[%s3695_s16 + $0xa8] sm:$0xff] %v2448_v10  ;;  %v2452_v13 = vsub.f32 1.0, %v2451_v9  ;;  %vm2470_vm13 = vweird.f32 %v2111_v7 }
 0x4a0   : > { %v1974_v15 = vpop.f32.mrf.mxu1  ;;  %v2477_v35 = vor.u32 1.1754944e-38, %v2476_v25  ;;  %vm2475_vm15 = vcmp.eq.f32.partialorder %v2474_v28, 8.507059e+37 }
 0x4a1   : > { %v2453_v16 = vmul.f32 %v3100_v5, %v2452_v13  ;;  %v1975_v47 = vadd.f32 %v3751_v29, %v1974_v15 }
 0x4a3   : > { %v3102_v45 = vpop.eup %3101  ;;  %v2454_v19 = vadd.f32 %v3100_v5, %v2453_v16  ;;  %v2914_v46 = vmul.f32 -1.442695, %v1975_v47 }
 0x4a4   : > { %v3104_v49 = vpop.eup %3103  ;;  %v2112_v20 = vadd.f32 1.0, %v3102_v45 }
 0x4a5   : > { %v2458_v21 = vsel %vm2457_vm10, %v3100_v5, %v2454_v19  ;;  %v2466_v22 = vmul.f32 %v3104_v49, %v2111_v7  ;;  %3105 = vpow2.f32 %v2914_v46  ;;  %vm2471_vm12 = vweird.f32 %v3104_v49 }
 0x4a6   : > { %v2463_v23 = vsel %vm2460_vm11, %v2462_v4, %v2458_v21  ;;  %3107 = vrcp.f32 %v2112_v20  ;;  %vm2472_vm14 = vmor %vm2470_vm13, %vm2471_vm12  ;;  %v2491_v40 = vand.u32 2147483648, %v2112_v20  ;;  %v2489_v43 = vand.u32 2147483647, %v2112_v20 }
 0x4a7   : > { %2622 = vst [vmem:[%s3695_s16 + $0xb0] sm:$0xff] %v2463_v23  ;;  %v2467_v24 = vsub.f32 1.0, %v2466_v22  ;;  %vm2485_vm1 = vweird.f32 %v2112_v20 }
 0x4a8   : > { %v1977_v26 = vpop.f32.mrf.mxu1  ;;  %v2492_v12 = vor.u32 1.1754944e-38, %v2491_v40  ;;  %vm2490_vm3 = vcmp.eq.f32.partialorder %v2489_v43, 8.507059e+37 }
 0x4a9   : > { %v2468_v27 = vmul.f32 %v3104_v49, %v2467_v24  ;;  %v1978_v30 = vadd.f32 %v3751_v29, %v1977_v26 }
 0x4ab   : > { %v3106_v31 = vpop.eup %3105  ;;  %v2469_v32 = vadd.f32 %v3104_v49, %v2468_v27  ;;  %v2915_v33 = vmul.f32 -1.442695, %v1978_v30 }
 0x4ac   : > { %v3108_v34 = vpop.eup %3107  ;;  %v2113_v36 = vadd.f32 1.0, %v3106_v31 }
 0x4ad   : > { %v2473_v11 = vsel %vm2472_vm14, %v3104_v49, %v2469_v32  ;;  %v2481_v37 = vmul.f32 %v3108_v34, %v2112_v20  ;;  %3109 = vpow2.f32 %v2915_v33  ;;  %vm2486_vm0 = vweird.f32 %v3108_v34 }
 0x4ae   : > { %v2478_v38 = vsel %vm2475_vm15, %v2477_v35, %v2473_v11  ;;  %3111 = vrcp.f32 %v2113_v36  ;;  %vm2487_vm2 = vmor %vm2485_vm1, %vm2486_vm0  ;;  %v2506_v56 = vand.u32 2147483648, %v2113_v36  ;;  %v2504_v61 = vand.u32 2147483647, %v2113_v36 }
 0x4af   : > { %2623 = vst [vmem:[%s3695_s16 + $0xb8] sm:$0xff] %v2478_v38  ;;  %v2482_v39 = vsub.f32 1.0, %v2481_v37  ;;  %vm2500_vm5 = vweird.f32 %v2113_v36 }
 0x4b0   : > { %v1979_v41 = vpop.f32.mrf.mxu1  ;;  %v2507_v3 = vor.u32 1.1754944e-38, %v2506_v56  ;;  %vm2505_vm7 = vcmp.eq.f32.partialorder %v2504_v61, 8.507059e+37 }
 0x4b1   : > { %v2483_v42 = vmul.f32 %v3108_v34, %v2482_v39  ;;  %v1980_v44 = vadd.f32 %v3751_v29, %v1979_v41 }
 0x4b3   : > { %v3110_v59 = vpop.eup %3109  ;;  %v2484_v48 = vadd.f32 %v3108_v34, %v2483_v42  ;;  %v2916_v50 = vmul.f32 -1.442695, %v1980_v44 }
 0x4b4   : > { %v3112_v51 = vpop.eup %3111  ;;  %v2114_v52 = vadd.f32 1.0, %v3110_v59 }
 0x4b5   : > { %v2488_v53 = vsel %vm2487_vm2, %v3108_v34, %v2484_v48  ;;  %v2496_v54 = vmul.f32 %v3112_v51, %v2113_v36  ;;  %3113 = vpow2.f32 %v2916_v50  ;;  %vm2501_vm4 = vweird.f32 %v3112_v51 }
 0x4b6   : > { %v2493_v18 = vsel %vm2490_vm3, %v2492_v12, %v2488_v53  ;;  %3115 = vrcp.f32 %v2114_v52  ;;  %vm2502_vm6 = vmor %vm2500_vm5, %vm2501_vm4  ;;  %v2521_v9 = vand.u32 2147483648, %v2114_v52  ;;  %v2519_v14 = vand.u32 2147483647, %v2114_v52 }
 0x4b7   : > { %2624 = vst [vmem:[%s3695_s16 + $0xc0] sm:$0xff] %v2493_v18  ;;  %v2497_v55 = vsub.f32 1.0, %v2496_v54  ;;  %vm2515_vm9 = vweird.f32 %v2114_v52 }
 0x4b8   : > { %v1982_v58 = vpop.f32.mrf.mxu1  ;;  %v2522_v19 = vor.u32 1.1754944e-38, %v2521_v9  ;;  %vm2520_vm11 = vcmp.eq.f32.partialorder %v2519_v14, 8.507059e+37 }
 0x4b9   : > { %v2498_v60 = vmul.f32 %v3112_v51, %v2497_v55  ;;  %v1983_v62 = vadd.f32 %v3751_v29, %v1982_v58 }
 0x4bb   : > { %v3114_v63 = vpop.eup %3113  ;;  %v2499_v0 = vadd.f32 %v3112_v51, %v2498_v60  ;;  %v2917_v1 = vmul.f32 -1.442695, %v1983_v62 }
 0x4bc   : > { %v3116_v2 = vpop.eup %3115  ;;  %v2115_v57 = vadd.f32 1.0, %v3114_v63 }
 0x4bd   : > { %v2503_v5 = vsel %vm2502_vm6, %v3112_v51, %v2499_v0  ;;  %v2511_v6 = vmul.f32 %v3116_v2, %v2114_v52  ;;  %3117 = vpow2.f32 %v2917_v1  ;;  %vm2516_vm8 = vweird.f32 %v3116_v2 }
 0x4be   : > { %v2508_v7 = vsel %vm2505_vm7, %v2507_v3, %v2503_v5  ;;  %3119 = vrcp.f32 %v2115_v57  ;;  %vm2517_vm10 = vmor %vm2515_vm9, %vm2516_vm8  ;;  %v2536_v22 = vand.u32 2147483648, %v2115_v57  ;;  %v2534_v25 = vand.u32 2147483647, %v2115_v57 }
 0x4bf   : > { %2625 = vst [vmem:[%s3695_s16 + $0xc8] sm:$0xff] %v2508_v7  ;;  %v2512_v8 = vsub.f32 1.0, %v2511_v6  ;;  %vm2530_vm13 = vweird.f32 %v2115_v57 }
 0x4c0   : > { %v1984_v10 = vpop.f32.mrf.mxu1  ;;  %v2537_v32 = vor.u32 1.1754944e-38, %v2536_v22  ;;  %vm2535_vm15 = vcmp.eq.f32.partialorder %v2534_v25, 8.507059e+37 }
 0x4c1   : > { %v2513_v13 = vmul.f32 %v3116_v2, %v2512_v8  ;;  %v1985_v15 = vadd.f32 %v3751_v29, %v1984_v10 }
 0x4c3   : > { %v3118_v16 = vpop.eup %3117  ;;  %v2514_v17 = vadd.f32 %v3116_v2, %v2513_v13  ;;  %v2918_v47 = vmul.f32 -1.442695, %v1985_v15 }
 0x4c4   : > { %v3120_v45 = vpop.eup %3119  ;;  %v2116_v46 = vadd.f32 1.0, %v3118_v16 }
 0x4c5   : > { %v2518_v49 = vsel %vm2517_vm10, %v3116_v2, %v2514_v17  ;;  %v2526_v4 = vmul.f32 %v3120_v45, %v2115_v57  ;;  %3121 = vpow2.f32 %v2918_v47  ;;  %vm2531_vm12 = vweird.f32 %v3120_v45 }
 0x4c6   : > { %v2523_v20 = vsel %vm2520_vm11, %v2522_v19, %v2518_v49  ;;  %3123 = vrcp.f32 %v2116_v46  ;;  %vm2532_vm14 = vmor %vm2530_vm13, %vm2531_vm12  ;;  %v2551_v37 = vand.u32 2147483648, %v2116_v46  ;;  %v2549_v40 = vand.u32 2147483647, %v2116_v46 }
 0x4c7   : > { %2626 = vst [vmem:[%s3695_s16 + $0xd0] sm:$0xff] %v2523_v20  ;;  %v2527_v21 = vsub.f32 1.0, %v2526_v4  ;;  %vm2545_vm1 = vweird.f32 %v2116_v46 }
 0x4c8   : > { %v1987_v23 = vpop.f32.mrf.mxu1  ;;  %v2552_v48 = vor.u32 1.1754944e-38, %v2551_v37  ;;  %vm2550_vm3 = vcmp.eq.f32.partialorder %v2549_v40, 8.507059e+37 }
 0x4c9   : > { %v2528_v24 = vmul.f32 %v3120_v45, %v2527_v21  ;;  %v1988_v26 = vadd.f32 %v3751_v29, %v1987_v23 }
 0x4cb   : > { %v3122_v27 = vpop.eup %3121  ;;  %v2529_v28 = vadd.f32 %v3120_v45, %v2528_v24  ;;  %v2919_v30 = vmul.f32 -1.442695, %v1988_v26 }
 0x4cc   : > { %v3124_v31 = vpop.eup %3123  ;;  %v2117_v33 = vadd.f32 1.0, %v3122_v27 }
 0x4cd   : > { %v2533_v34 = vsel %vm2532_vm14, %v3120_v45, %v2529_v28  ;;  %v2541_v35 = vmul.f32 %v3124_v31, %v2116_v46  ;;  %3125 = vpow2.f32 %v2919_v30  ;;  %vm2546_vm0 = vweird.f32 %v3124_v31 }
 0x4ce   : > { %v2538_v36 = vsel %vm2535_vm15, %v2537_v32, %v2533_v34  ;;  %3127 = vrcp.f32 %v2117_v33  ;;  %vm2547_vm2 = vmor %vm2545_vm1, %vm2546_vm0  ;;  %v2566_v54 = vand.u32 2147483648, %v2117_v33  ;;  %vm2560_vm5 = vweird.f32 %v2117_v33 }
 0x4cf   : > { %2627 = vst [vmem:[%s3695_s16 + $0xd8] sm:$0xff] %v2538_v36  ;;  %v2542_v11 = vsub.f32 1.0, %v2541_v35 }
 0x4d0   : > { %v1989_v38 = vpop.f32.mrf.mxu1  ;;  %v2567_v60 = vor.u32 1.1754944e-38, %v2566_v54 }
 0x4d1   : > { %v2543_v39 = vmul.f32 %v3124_v31, %v2542_v11  ;;  %v1990_v41 = vadd.f32 %v3751_v29, %v1989_v38  ;;  %v2564_v29 = vand.u32 2147483647, %v2117_v33 }
 0x4d3   : > { %v3126_v42 = vpop.eup %3125  ;;  %v2544_v43 = vadd.f32 %v3124_v31, %v2543_v39  ;;  %v2920_v44 = vmul.f32 -1.442695, %v1990_v41  ;;  %vm2565_vm7 = vcmp.eq.f32.partialorder %v2564_v29, 8.507059e+37 }
 0x4d4   : > { %v3128_v59 = vpop.eup %3127  ;;  %v2118_v50 = vadd.f32 1.0, %v3126_v42 }
 0x4d5   : > { %v2548_v51 = vsel %vm2547_vm2, %v3124_v31, %v2544_v43  ;;  %v2556_v12 = vmul.f32 %v3128_v59, %v2117_v33  ;;  %3129 = vpow2.f32 %v2920_v44  ;;  %vm2561_vm4 = vweird.f32 %v3128_v59 }
 0x4d6   : > { %v2553_v52 = vsel %vm2550_vm3, %v2552_v48, %v2548_v51  ;;  %3131 = vrcp.f32 %v2118_v50  ;;  %vm2562_vm6 = vmor %vm2560_vm5, %vm2561_vm4  ;;  %v2581_v2 = vand.u32 2147483648, %v2118_v50  ;;  %v2579_v57 = vand.u32 2147483647, %v2118_v50 }
 0x4d7   : > { %2628 = vst [vmem:[%s3695_s16 + $0xe0] sm:$0xff] %v2553_v52  ;;  %v2557_v53 = vsub.f32 1.0, %v2556_v12  ;;  %vm2575_vm9 = vweird.f32 %v2118_v50 }
 0x4d8   : > { %v2582_v7 = vor.u32 1.1754944e-38, %v2581_v2  ;;  %vm2580_vm11 = vcmp.eq.f32.partialorder %v2579_v57, 8.507059e+37 }
 0x4d9   : > { %v2558_v18 = vmul.f32 %v3128_v59, %v2557_v53 }
 0x4db   : > { %v3130_v55 = vpop.eup %3129  ;;  %v2559_v56 = vadd.f32 %v3128_v59, %v2558_v18 }
 0x4dc   : > { %v3132_v58 = vpop.eup %3131  ;;  %v2119_v61 = vadd.f32 1.0, %v3130_v55 }
 0x4dd   : > { %v2563_v62 = vsel %vm2562_vm6, %v3128_v59, %v2559_v56  ;;  %v2571_v63 = vmul.f32 %v3132_v58, %v2118_v50  ;;  %vm2576_vm8 = vweird.f32 %v3132_v58 }
 0x4de   : > { %v2568_v0 = vsel %vm2565_vm7, %v2567_v60, %v2563_v62  ;;  %3133 = vrcp.f32 %v2119_v61  ;;  %vm2577_vm10 = vmor %vm2575_vm9, %vm2576_vm8  ;;  %v2596_v14 = vand.u32 2147483648, %v2119_v61  ;;  %v2594_v16 = vand.u32 2147483647, %v2119_v61 }
 0x4df   : > { %2629 = vst [vmem:[%s3695_s16 + $0xe8] sm:$0xff] %v2568_v0  ;;  %v2572_v1 = vsub.f32 1.0, %v2571_v63  ;;  %vm2590_vm13 = vweird.f32 %v2119_v61 }
 0x4e0   : > { %v2597_v47 = vor.u32 1.1754944e-38, %v2596_v14  ;;  %vm2595_vm15 = vcmp.eq.f32.partialorder %v2594_v16, 8.507059e+37 }
 0x4e1   : > { %v2573_v3 = vmul.f32 %v3132_v58, %v2572_v1 }
 0x4e3   : > { %v2574_v5 = vadd.f32 %v3132_v58, %v2573_v3 }
 0x4e4   : > { %v3134_v6 = vpop.eup %3133 }
 0x4e5   : > { %v2578_v8 = vsel %vm2577_vm10, %v3132_v58, %v2574_v5  ;;  %v2586_v9 = vmul.f32 %v3134_v6, %v2119_v61  ;;  %vm2591_vm12 = vweird.f32 %v3134_v6 }
 0x4e6   : > { %v2583_v10 = vsel %vm2580_vm11, %v2582_v7, %v2578_v8  ;;  %vm2592_vm14 = vmor %vm2590_vm13, %vm2591_vm12 }
 0x4e7   : > { %2630 = vst [vmem:[%s3695_s16 + $0xf0] sm:$0xff] %v2583_v10  ;;  %v2587_v13 = vsub.f32 1.0, %v2586_v9 }
 0x4e9   : > { %v2588_v15 = vmul.f32 %v3134_v6, %v2587_v13 }
 0x4eb   : > { %v2589_v17 = vadd.f32 %v3134_v6, %v2588_v15 }
 0x4ed   : > { %v2593_v45 = vsel %vm2592_vm14, %v3134_v6, %v2589_v17 }
 0x4ee   : > { %v2598_v19 = vsel %vm2595_vm15, %v2597_v47, %v2593_v45 }
 0x4ef   : > { %2631 = vst [vmem:[%s3695_s16 + $0xf8] sm:$0xff] %v2598_v19 }
 0x4f0 PF: > { %s25_s18 = sadd.s32 1, %s3142_s18  }
 0x4f1   : > { %p22_p4 = scmp.ge.s32.totalorder %s25_s18, 4  }
 0x4f3   :  { %24 = sbr.rel (!%p22_p4) target bundleno = 1 (0x1), region = 110 }

</bundles_post_ra>
